<compile_context>
chip_gen: v5e
topology: v5e:2x2
jax: 0.10.0
libtpu: 0.0.40
codegen_flags: <defaults>
</compile_context>

<pallas_src>
import functools

import jax
import jax.numpy as jnp
from jax import lax
from jax.experimental import pallas as pl
from jax.experimental.pallas import tpu as pltpu


def _newton_recip(x):
    # EUP approximate reciprocal + one Newton-Raphson step (~f32 accuracy).
    r = pl.reciprocal(x, approx=True)
    return r * (2.0 - x * r)


# ----------------------------------------------------------------------------
# Fused MHA kernel.  One grid step = (batch b, query tile qi).
#   self_attn=True : refs = (x, Wq,bq, Wk,bk, Wv,bv, Wo,bo, out, concat)
#   self_attn=False: refs = (q, k, v, Wq,bq, ..., Wo,bo, out, concat)
# ----------------------------------------------------------------------------
def _fused_mha_kernel(*refs, head, scale, tq, self_attn):
    if self_attn:
        (x_ref, wq_ref, bq_ref, wk_ref, bk_ref, wv_ref, bv_ref,
         wo_ref, bo_ref, o_ref, cat_ref) = refs
        q_start = pl.multiple_of(pl.program_id(1) * tq, tq)
        xq = x_ref[pl.ds(q_start, tq), :]      # (tq, D) query slice of x
        xk = x_ref[...]                        # (S,  D) full activation
        xv = xk
    else:
        (q_ref, k_ref, v_ref, wq_ref, bq_ref, wk_ref, bk_ref, wv_ref, bv_ref,
         wo_ref, bo_ref, o_ref, cat_ref) = refs
        xq = q_ref[...]                        # (tq, D)
        xk = k_ref[...]                        # (Sk, D)
        xv = v_ref[...]                        # (Sk, D)

    bf16 = jnp.bfloat16
    wq = wq_ref[...].astype(bf16)
    wk = wk_ref[...].astype(bf16)
    wv = wv_ref[...].astype(bf16)
    wo = wo_ref[...].astype(bf16)

    # Q / K / V projections: bf16 MXU operands, f32 accumulation + f32 bias.
    qp = jnp.dot(xq.astype(bf16), wq,
                 preferred_element_type=jnp.float32) + bq_ref[...]
    kp = jnp.dot(xk.astype(bf16), wk,
                 preferred_element_type=jnp.float32) + bk_ref[...]
    vp = (jnp.dot(xv.astype(bf16), wv,
                  preferred_element_type=jnp.float32) + bv_ref[...]).astype(bf16)

    D = qp.shape[-1]
    dh = D // head

    for h in range(head):                      # static unroll; head is small
        sl = slice(h * dh, (h + 1) * dh)
        qh = (qp[:, sl] * scale).astype(bf16)  # fold 1/sqrt(d_head) into q
        kh = kp[:, sl].astype(bf16)
        # Contract on the LAST dim of both -> no in-kernel k.T / XLU transpose.
        s = lax.dot_general(qh, kh, (((1,), (1,)), ((), ())),
                            preferred_element_type=jnp.float32)   # (tq, Sk)
        m = jnp.max(s, axis=-1, keepdims=True)
        p = jnp.exp(s - m)                                         # f32 softmax
        att = p * _newton_recip(jnp.sum(p, axis=-1, keepdims=True))
        oh = jnp.dot(att.astype(bf16), vp[:, sl],
                     preferred_element_type=jnp.float32)           # (tq, dh)
        cat_ref[:, sl] = oh                    # concat heads in VMEM scratch

    # One full-K-depth output projection + single lane-dense (tq, D) store.
    out = jnp.dot(cat_ref[...].astype(bf16), wo,
                  preferred_element_type=jnp.float32) + bo_ref[...]
    o_ref[...] = out.astype(o_ref.dtype)


def multi_head_attention(params, q, k, v, head, *, q_tile=256):
    B, Sq, D = q.shape
    _, Sk, _ = k.shape
    assert D % head == 0, "head must divide d_model"
    assert k.shape == v.shape and k.shape[0] == B and k.shape[2] == D
    scale = 1.0 / float(D // head) ** 0.5

    tq = min(q_tile, Sq)
    if Sq % tq != 0 or tq % 8 != 0:
        tq = Sq  # TODO(synk): pad/mask ragged query tiles instead of one tile
    num_q = Sq // tq

    self_attn = (q is k) and (k is v)

    bq = params["bq"].reshape(1, D)
    bk = params["bk"].reshape(1, D)
    bv = params["bv"].reshape(1, D)
    bo = params["bo"].reshape(1, D)

    if self_attn:
        # Single activation input, reused for all three projections.
        seq_specs = [pl.BlockSpec((None, Sq, D), lambda b, qi: (b, 0, 0))]
        seq_inputs = (q,)
        act_bytes = Sq * D * 4 * 2
    else:
        seq_specs = [pl.BlockSpec((None, tq, D), lambda b, qi: (b, qi, 0)),
                     pl.BlockSpec((None, Sk, D), lambda b, qi: (b, 0, 0)),
                     pl.BlockSpec((None, Sk, D), lambda b, qi: (b, 0, 0))]
        seq_inputs = (q, k, v)
        act_bytes = (tq + 2 * Sk) * D * 4 * 2

    # VMEM budget: single-buffered weights + double-buffered activations/output
    # + concat scratch + rough in-kernel intermediates, with 2x headroom.
    est = (4 * D * D * 4                      # weights (1 buffer each)
           + 4 * max(D, 128) * 8 * 4          # padded bias tiles
           + act_bytes                        # seq inputs (2 buffers)
           + tq * D * 4 * 3                   # output (2 buffers) + scratch
           + (3 * tq * D + 2 * Sk * D + tq * Sk) * 4)   # qp/kp/vp/scores
    vmem_limit = int(min(64 << 20, max(32 << 20, 2 * est)))

    kernel = functools.partial(_fused_mha_kernel, head=head, scale=scale,
                               tq=tq, self_attn=self_attn)

    def run(single_buffer_weights):
        if single_buffer_weights:
            # Constant block index across the whole grid -> one VMEM buffer.
            w_spec = pl.BlockSpec((D, D), lambda b, qi: (0, 0),
                                  pipeline_mode=pl.Buffered(1))
            b_spec = pl.BlockSpec((1, D), lambda b, qi: (0, 0),
                                  pipeline_mode=pl.Buffered(1))
        else:
            w_spec = pl.BlockSpec((D, D), lambda b, qi: (0, 0))
            b_spec = pl.BlockSpec((1, D), lambda b, qi: (0, 0))
        return pl.pallas_call(
            kernel,
            out_shape=jax.ShapeDtypeStruct((B, Sq, D), q.dtype),
            grid=(B, num_q),
            in_specs=list(seq_specs) + [w_spec, b_spec, w_spec, b_spec,
                                        w_spec, b_spec, w_spec, b_spec],
            out_specs=pl.BlockSpec((None, tq, D), lambda b, qi: (b, qi, 0)),
            scratch_shapes=[pltpu.VMEM((tq, D), jnp.float32)],
            compiler_params=pltpu.CompilerParams(
                dimension_semantics=("parallel", "parallel"),
                vmem_limit_bytes=vmem_limit),
        )(*seq_inputs,
          params["Wq"], bq, params["Wk"], bk, params["Wv"], bv,
          params["Wo"], bo)

    try:
        return run(single_buffer_weights=True)
    except Exception:
        # Fallback for jax builds without single-buffered BlockSpec support
        # (pl.Buffered(1)); everything else is identical.
        return run(single_buffer_weights=False)


# ----------------------------------------------------------------------------
# Parameters (weights stored as (in, out), i.e. already transposed vs torch).
# ----------------------------------------------------------------------------
def init_mha_params(key, d_model):
    ks = jax.random.split(key, 8)
    # torch nn.Linear default init: U(-1/sqrt(fan_in), 1/sqrt(fan_in))
    bound = 1.0 / float(d_model) ** 0.5

    def w(k):
        return jax.random.uniform(
            k, (d_model, d_model), jnp.float32, minval=-bound, maxval=bound)

    def b(k):
        return jax.random.uniform(
            k, (d_model,), jnp.float32, minval=-bound, maxval=bound)

    return {
        "Wq": w(ks[0]), "bq": b(ks[1]),
        "Wk": w(ks[2]), "bk": b(ks[3]),
        "Wv": w(ks[4]), "bv": b(ks[5]),
        "Wo": w(ks[6]), "bo": b(ks[7]),
    }


# ----------------------------------------------------------------------------
# Pure-JAX (f32) reference for the sanity check.
# ----------------------------------------------------------------------------
def mha_reference(params, q, k, v, head):
    B, S, d_model = q.shape
    d_head = d_model // head

    def lin(x, W, b):
        return x @ W + b

    def split(x):
        return x.reshape(B, S, head, d_head).transpose(0, 2, 1, 3)

    qh = split(lin(q, params["Wq"], params["bq"]))
    kh = split(lin(k, params["Wk"], params["bk"]))
    vh = split(lin(v, params["Wv"], params["bv"]))

    s = jnp.einsum("bhqd,bhkd->bhqk", qh, kh) / jnp.sqrt(jnp.float32(d_head))
    att = jax.nn.softmax(s, axis=-1)
    o = jnp.einsum("bhqk,bhkd->bhqd", att, vh)
    o = o.transpose(0, 2, 1, 3).reshape(B, S, d_model)
    return lin(o, params["Wo"], params["bo"])


if __name__ == "__main__":
    key = jax.random.PRNGKey(0)
    B, S, d_model, head = 2, 8, 32, 4

    kparams, kx, kq, kk, kv = jax.random.split(key, 5)
    params = init_mha_params(kparams, d_model)

    # Self-attention path: q = k = v = x (single activation streamed once).
    x = jax.random.normal(kx, (B, S, d_model), jnp.float32)
    out_self = jax.block_until_ready(multi_head_attention(params, x, x, x, head))
    ref_self = mha_reference(params, x, x, x, head)
    assert out_self.shape == (B, S, d_model)
    # bf16 MXU operands -> looser tolerance vs. the pure-f32 reference.
    assert jnp.allclose(out_self, ref_self, atol=5e-2, rtol=5e-2), (
        f"self-attn mismatch, max abs err "
        f"{jnp.max(jnp.abs(out_self - ref_self))}")

    # Cross-attention path: distinct q / k / v tensors.
    q2 = jax.random.normal(kq, (B, S, d_model), jnp.float32)
    k2 = jax.random.normal(kk, (B, S, d_model), jnp.float32)
    v2 = jax.random.normal(kv, (B, S, d_model), jnp.float32)
    out_x = jax.block_until_ready(multi_head_attention(params, q2, k2, v2, head))
    ref_x = mha_reference(params, q2, k2, v2, head)
    assert jnp.allclose(out_x, ref_x, atol=5e-2, rtol=5e-2), (
        f"cross-attn mismatch, max abs err {jnp.max(jnp.abs(out_x - ref_x))}")

    print("KERNEL_OK")
</pallas_src>

<mosaic_0001>
module attributes {stable_mosaic.version = 11 : i64} {
  func.func @_fused_mha_kernel(%arg0: i32, %arg1: i32, %arg2: memref<1x8x32xf32, #tpu.memory_space<vmem>>, %arg3: memref<32x32xf32, #tpu.memory_space<vmem>>, %arg4: memref<1x32xf32, #tpu.memory_space<vmem>>, %arg5: memref<32x32xf32, #tpu.memory_space<vmem>>, %arg6: memref<1x32xf32, #tpu.memory_space<vmem>>, %arg7: memref<32x32xf32, #tpu.memory_space<vmem>>, %arg8: memref<1x32xf32, #tpu.memory_space<vmem>>, %arg9: memref<32x32xf32, #tpu.memory_space<vmem>>, %arg10: memref<1x32xf32, #tpu.memory_space<vmem>>, %arg11: memref<1x8x32xf32, #tpu.memory_space<vmem>>, %arg12: memref<8x32xf32, #tpu.memory_space<vmem>>) attributes {dimension_semantics = [#tpu.dimension_semantics<parallel>, #tpu.dimension_semantics<parallel>], iteration_bounds = array<i64: 2, 1>, scalar_prefetch = 0 : i64, scratch_operands = 1 : i64, tpu.core_type = #tpu.core_type<tc>, window_params = [{transform_indices = @transform_0, window_bounds = array<i64: 1, 8, 32>}, {pipeline_mode = #tpu.pipeline_mode<synchronous>, transform_indices = @transform_1, window_bounds = array<i64: 32, 32>}, {pipeline_mode = #tpu.pipeline_mode<synchronous>, transform_indices = @transform_2, window_bounds = array<i64: 1, 32>}, {pipeline_mode = #tpu.pipeline_mode<synchronous>, transform_indices = @transform_3, window_bounds = array<i64: 32, 32>}, {pipeline_mode = #tpu.pipeline_mode<synchronous>, transform_indices = @transform_4, window_bounds = array<i64: 1, 32>}, {pipeline_mode = #tpu.pipeline_mode<synchronous>, transform_indices = @transform_5, window_bounds = array<i64: 32, 32>}, {pipeline_mode = #tpu.pipeline_mode<synchronous>, transform_indices = @transform_6, window_bounds = array<i64: 1, 32>}, {pipeline_mode = #tpu.pipeline_mode<synchronous>, transform_indices = @transform_7, window_bounds = array<i64: 32, 32>}, {pipeline_mode = #tpu.pipeline_mode<synchronous>, transform_indices = @transform_8, window_bounds = array<i64: 1, 32>}, {transform_indices = @transform_9, window_bounds = array<i64: 1, 8, 32>}]} {
    %c8_i32 = arith.constant 8 : i32
    %0 = arith.muli %arg1, %c8_i32 : i32
    %1 = tpu.assume_multiple %0, 8 : i32
    %c0 = arith.constant 0 : index
    %2 = arith.index_cast %1 : i32 to index
    %c0_0 = arith.constant 0 : index
    %3 = vector.load %arg2[%c0, %2, %c0_0] : memref<1x8x32xf32, #tpu.memory_space<vmem>>, vector<1x8x32xf32>
    %4 = vector.shape_cast %3 : vector<1x8x32xf32> to vector<8x32xf32>
    %c0_1 = arith.constant 0 : index
    %c0_2 = arith.constant 0 : index
    %c0_3 = arith.constant 0 : index
    %5 = vector.load %arg2[%c0_1, %c0_2, %c0_3] : memref<1x8x32xf32, #tpu.memory_space<vmem>>, vector<1x8x32xf32>
    %6 = vector.shape_cast %5 : vector<1x8x32xf32> to vector<8x32xf32>
    %c0_4 = arith.constant 0 : index
    %c0_5 = arith.constant 0 : index
    %7 = vector.load %arg3[%c0_4, %c0_5] : memref<32x32xf32, #tpu.memory_space<vmem>>, vector<32x32xf32>
    %8 = arith.truncf %7 : vector<32x32xf32> to vector<32x32xbf16>
    %c0_6 = arith.constant 0 : index
    %c0_7 = arith.constant 0 : index
    %9 = vector.load %arg5[%c0_6, %c0_7] : memref<32x32xf32, #tpu.memory_space<vmem>>, vector<32x32xf32>
    %10 = arith.truncf %9 : vector<32x32xf32> to vector<32x32xbf16>
    %c0_8 = arith.constant 0 : index
    %c0_9 = arith.constant 0 : index
    %11 = vector.load %arg7[%c0_8, %c0_9] : memref<32x32xf32, #tpu.memory_space<vmem>>, vector<32x32xf32>
    %12 = arith.truncf %11 : vector<32x32xf32> to vector<32x32xbf16>
    %c0_10 = arith.constant 0 : index
    %c0_11 = arith.constant 0 : index
    %13 = vector.load %arg9[%c0_10, %c0_11] : memref<32x32xf32, #tpu.memory_space<vmem>>, vector<32x32xf32>
    %14 = arith.truncf %13 : vector<32x32xf32> to vector<32x32xbf16>
    %15 = arith.truncf %4 : vector<8x32xf32> to vector<8x32xbf16>
    %cst = arith.constant dense<0.000000e+00> : vector<8x32xf32>
    %16 = tpu.matmul %15, %8, %cst {dimension_numbers = #tpu.dot_dimension_numbers<[1], [0], [0], [1], [0, 0, 1, 1], [], []>} : vector<8x32xbf16>, vector<32x32xbf16>, vector<8x32xf32> -> vector<8x32xf32>
    %c0_12 = arith.constant 0 : index
    %c0_13 = arith.constant 0 : index
    %17 = vector.load %arg4[%c0_12, %c0_13] : memref<1x32xf32, #tpu.memory_space<vmem>>, vector<1x32xf32>
    %18 = vector.broadcast %17 : vector<1x32xf32> to vector<8x32xf32>
    %19 = arith.addf %16, %18 : vector<8x32xf32>
    %20 = arith.truncf %6 : vector<8x32xf32> to vector<8x32xbf16>
    %cst_14 = arith.constant dense<0.000000e+00> : vector<8x32xf32>
    %21 = tpu.matmul %20, %10, %cst_14 {dimension_numbers = #tpu.dot_dimension_numbers<[1], [0], [0], [1], [0, 0, 1, 1], [], []>} : vector<8x32xbf16>, vector<32x32xbf16>, vector<8x32xf32> -> vector<8x32xf32>
    %c0_15 = arith.constant 0 : index
    %c0_16 = arith.constant 0 : index
    %22 = vector.load %arg6[%c0_15, %c0_16] : memref<1x32xf32, #tpu.memory_space<vmem>>, vector<1x32xf32>
    %23 = vector.broadcast %22 : vector<1x32xf32> to vector<8x32xf32>
    %24 = arith.addf %21, %23 : vector<8x32xf32>
    %25 = arith.truncf %6 : vector<8x32xf32> to vector<8x32xbf16>
    %cst_17 = arith.constant dense<0.000000e+00> : vector<8x32xf32>
    %26 = tpu.matmul %25, %12, %cst_17 {dimension_numbers = #tpu.dot_dimension_numbers<[1], [0], [0], [1], [0, 0, 1, 1], [], []>} : vector<8x32xbf16>, vector<32x32xbf16>, vector<8x32xf32> -> vector<8x32xf32>
    %c0_18 = arith.constant 0 : index
    %c0_19 = arith.constant 0 : index
    %27 = vector.load %arg8[%c0_18, %c0_19] : memref<1x32xf32, #tpu.memory_space<vmem>>, vector<1x32xf32>
    %28 = vector.broadcast %27 : vector<1x32xf32> to vector<8x32xf32>
    %29 = arith.addf %26, %28 : vector<8x32xf32>
    %30 = arith.truncf %29 : vector<8x32xf32> to vector<8x32xbf16>
    %31 = vector.extract_strided_slice %19 {offsets = [0, 0], sizes = [8, 8], strides = [1, 1]} : vector<8x32xf32> to vector<8x8xf32>
    %cst_20 = arith.constant 0.353553385 : f32
    %32 = vector.broadcast %cst_20 : f32 to vector<8x8xf32>
    %33 = arith.mulf %31, %32 : vector<8x8xf32>
    %34 = arith.truncf %33 : vector<8x8xf32> to vector<8x8xbf16>
    %35 = vector.extract_strided_slice %24 {offsets = [0, 0], sizes = [8, 8], strides = [1, 1]} : vector<8x32xf32> to vector<8x8xf32>
    %36 = arith.truncf %35 : vector<8x8xf32> to vector<8x8xbf16>
    %cst_21 = arith.constant dense<0.000000e+00> : vector<8x8xf32>
    %37 = tpu.matmul %34, %36, %cst_21 {dimension_numbers = #tpu.dot_dimension_numbers<[1], [1], [0], [0], [0, 0, 1, 0], [], []>} : vector<8x8xbf16>, vector<8x8xbf16>, vector<8x8xf32> -> vector<8x8xf32>
    %cst_22 = arith.constant dense<0xFF800000> : vector<8xf32>
    %38 = vector.multi_reduction <maximumf>, %37, %cst_22 [1] : vector<8x8xf32> to vector<8xf32>
    %39 = vector.shape_cast %38 : vector<8xf32> to vector<8x1xf32>
    %40 = vector.broadcast %39 : vector<8x1xf32> to vector<8x8xf32>
    %41 = arith.subf %37, %40 : vector<8x8xf32>
    %42 = math.exp %41 : vector<8x8xf32>
    %cst_23 = arith.constant dense<0.000000e+00> : vector<8xf32>
    %43 = vector.multi_reduction <add>, %42, %cst_23 [1] : vector<8x8xf32> to vector<8xf32>
    %44 = vector.shape_cast %43 : vector<8xf32> to vector<8x1xf32>
    %45 = tpu.reciprocal %44 {approx = true} : vector<8x1xf32> -> vector<8x1xf32>
    %46 = arith.mulf %44, %45 : vector<8x1xf32>
    %cst_24 = arith.constant 2.000000e+00 : f32
    %47 = vector.broadcast %cst_24 : f32 to vector<8x1xf32>
    %48 = arith.subf %47, %46 : vector<8x1xf32>
    %49 = arith.mulf %45, %48 : vector<8x1xf32>
    %50 = vector.broadcast %49 : vector<8x1xf32> to vector<8x8xf32>
    %51 = arith.mulf %42, %50 : vector<8x8xf32>
    %52 = arith.truncf %51 : vector<8x8xf32> to vector<8x8xbf16>
    %53 = vector.extract_strided_slice %30 {offsets = [0, 0], sizes = [8, 8], strides = [1, 1]} : vector<8x32xbf16> to vector<8x8xbf16>
    %cst_25 = arith.constant dense<0.000000e+00> : vector<8x8xf32>
    %54 = tpu.matmul %52, %53, %cst_25 {dimension_numbers = #tpu.dot_dimension_numbers<[1], [0], [0], [1], [0, 0, 1, 1], [], []>} : vector<8x8xbf16>, vector<8x8xbf16>, vector<8x8xf32> -> vector<8x8xf32>
    %c0_26 = arith.constant 0 : index
    %c0_27 = arith.constant 0 : index
    %55 = vector.load %arg12[%c0_26, %c0_27] : memref<8x32xf32, #tpu.memory_space<vmem>>, vector<8x8xf32>
    tpu.vector_store %arg12[%c0_26, %c0_27], %54 {strides = array<i32>} : memref<8x32xf32, #tpu.memory_space<vmem>>, vector<8x8xf32>,
    %56 = vector.extract_strided_slice %19 {offsets = [0, 8], sizes = [8, 8], strides = [1, 1]} : vector<8x32xf32> to vector<8x8xf32>
    %cst_28 = arith.constant 0.353553385 : f32
    %57 = vector.broadcast %cst_28 : f32 to vector<8x8xf32>
    %58 = arith.mulf %56, %57 : vector<8x8xf32>
    %59 = arith.truncf %58 : vector<8x8xf32> to vector<8x8xbf16>
    %60 = vector.extract_strided_slice %24 {offsets = [0, 8], sizes = [8, 8], strides = [1, 1]} : vector<8x32xf32> to vector<8x8xf32>
    %61 = arith.truncf %60 : vector<8x8xf32> to vector<8x8xbf16>
    %cst_29 = arith.constant dense<0.000000e+00> : vector<8x8xf32>
    %62 = tpu.matmul %59, %61, %cst_29 {dimension_numbers = #tpu.dot_dimension_numbers<[1], [1], [0], [0], [0, 0, 1, 0], [], []>} : vector<8x8xbf16>, vector<8x8xbf16>, vector<8x8xf32> -> vector<8x8xf32>
    %cst_30 = arith.constant dense<0xFF800000> : vector<8xf32>
    %63 = vector.multi_reduction <maximumf>, %62, %cst_30 [1] : vector<8x8xf32> to vector<8xf32>
    %64 = vector.shape_cast %63 : vector<8xf32> to vector<8x1xf32>
    %65 = vector.broadcast %64 : vector<8x1xf32> to vector<8x8xf32>
    %66 = arith.subf %62, %65 : vector<8x8xf32>
    %67 = math.exp %66 : vector<8x8xf32>
    %cst_31 = arith.constant dense<0.000000e+00> : vector<8xf32>
    %68 = vector.multi_reduction <add>, %67, %cst_31 [1] : vector<8x8xf32> to vector<8xf32>
    %69 = vector.shape_cast %68 : vector<8xf32> to vector<8x1xf32>
    %70 = tpu.reciprocal %69 {approx = true} : vector<8x1xf32> -> vector<8x1xf32>
    %71 = arith.mulf %69, %70 : vector<8x1xf32>
    %cst_32 = arith.constant 2.000000e+00 : f32
    %72 = vector.broadcast %cst_32 : f32 to vector<8x1xf32>
    %73 = arith.subf %72, %71 : vector<8x1xf32>
    %74 = arith.mulf %70, %73 : vector<8x1xf32>
    %75 = vector.broadcast %74 : vector<8x1xf32> to vector<8x8xf32>
    %76 = arith.mulf %67, %75 : vector<8x8xf32>
    %77 = arith.truncf %76 : vector<8x8xf32> to vector<8x8xbf16>
    %78 = vector.extract_strided_slice %30 {offsets = [0, 8], sizes = [8, 8], strides = [1, 1]} : vector<8x32xbf16> to vector<8x8xbf16>
    %cst_33 = arith.constant dense<0.000000e+00> : vector<8x8xf32>
    %79 = tpu.matmul %77, %78, %cst_33 {dimension_numbers = #tpu.dot_dimension_numbers<[1], [0], [0], [1], [0, 0, 1, 1], [], []>} : vector<8x8xbf16>, vector<8x8xbf16>, vector<8x8xf32> -> vector<8x8xf32>
    %c0_34 = arith.constant 0 : index
    %c8 = arith.constant 8 : index
    %80 = vector.load %arg12[%c0_34, %c8] : memref<8x32xf32, #tpu.memory_space<vmem>>, vector<8x8xf32>
    tpu.vector_store %arg12[%c0_34, %c8], %79 {strides = array<i32>} : memref<8x32xf32, #tpu.memory_space<vmem>>, vector<8x8xf32>,
    %81 = vector.extract_strided_slice %19 {offsets = [0, 16], sizes = [8, 8], strides = [1, 1]} : vector<8x32xf32> to vector<8x8xf32>
    %cst_35 = arith.constant 0.353553385 : f32
    %82 = vector.broadcast %cst_35 : f32 to vector<8x8xf32>
    %83 = arith.mulf %81, %82 : vector<8x8xf32>
    %84 = arith.truncf %83 : vector<8x8xf32> to vector<8x8xbf16>
    %85 = vector.extract_strided_slice %24 {offsets = [0, 16], sizes = [8, 8], strides = [1, 1]} : vector<8x32xf32> to vector<8x8xf32>
    %86 = arith.truncf %85 : vector<8x8xf32> to vector<8x8xbf16>
    %cst_36 = arith.constant dense<0.000000e+00> : vector<8x8xf32>
    %87 = tpu.matmul %84, %86, %cst_36 {dimension_numbers = #tpu.dot_dimension_numbers<[1], [1], [0], [0], [0, 0, 1, 0], [], []>} : vector<8x8xbf16>, vector<8x8xbf16>, vector<8x8xf32> -> vector<8x8xf32>
    %cst_37 = arith.constant dense<0xFF800000> : vector<8xf32>
    %88 = vector.multi_reduction <maximumf>, %87, %cst_37 [1] : vector<8x8xf32> to vector<8xf32>
    %89 = vector.shape_cast %88 : vector<8xf32> to vector<8x1xf32>
    %90 = vector.broadcast %89 : vector<8x1xf32> to vector<8x8xf32>
    %91 = arith.subf %87, %90 : vector<8x8xf32>
    %92 = math.exp %91 : vector<8x8xf32>
    %cst_38 = arith.constant dense<0.000000e+00> : vector<8xf32>
    %93 = vector.multi_reduction <add>, %92, %cst_38 [1] : vector<8x8xf32> to vector<8xf32>
    %94 = vector.shape_cast %93 : vector<8xf32> to vector<8x1xf32>
    %95 = tpu.reciprocal %94 {approx = true} : vector<8x1xf32> -> vector<8x1xf32>
    %96 = arith.mulf %94, %95 : vector<8x1xf32>
    %cst_39 = arith.constant 2.000000e+00 : f32
    %97 = vector.broadcast %cst_39 : f32 to vector<8x1xf32>
    %98 = arith.subf %97, %96 : vector<8x1xf32>
    %99 = arith.mulf %95, %98 : vector<8x1xf32>
    %100 = vector.broadcast %99 : vector<8x1xf32> to vector<8x8xf32>
    %101 = arith.mulf %92, %100 : vector<8x8xf32>
    %102 = arith.truncf %101 : vector<8x8xf32> to vector<8x8xbf16>
    %103 = vector.extract_strided_slice %30 {offsets = [0, 16], sizes = [8, 8], strides = [1, 1]} : vector<8x32xbf16> to vector<8x8xbf16>
    %cst_40 = arith.constant dense<0.000000e+00> : vector<8x8xf32>
    %104 = tpu.matmul %102, %103, %cst_40 {dimension_numbers = #tpu.dot_dimension_numbers<[1], [0], [0], [1], [0, 0, 1, 1], [], []>} : vector<8x8xbf16>, vector<8x8xbf16>, vector<8x8xf32> -> vector<8x8xf32>
    %c0_41 = arith.constant 0 : index
    %c16 = arith.constant 16 : index
    %105 = vector.load %arg12[%c0_41, %c16] : memref<8x32xf32, #tpu.memory_space<vmem>>, vector<8x8xf32>
    tpu.vector_store %arg12[%c0_41, %c16], %104 {strides = array<i32>} : memref<8x32xf32, #tpu.memory_space<vmem>>, vector<8x8xf32>,
    %106 = vector.extract_strided_slice %19 {offsets = [0, 24], sizes = [8, 8], strides = [1, 1]} : vector<8x32xf32> to vector<8x8xf32>
    %cst_42 = arith.constant 0.353553385 : f32
    %107 = vector.broadcast %cst_42 : f32 to vector<8x8xf32>
    %108 = arith.mulf %106, %107 : vector<8x8xf32>
    %109 = arith.truncf %108 : vector<8x8xf32> to vector<8x8xbf16>
    %110 = vector.extract_strided_slice %24 {offsets = [0, 24], sizes = [8, 8], strides = [1, 1]} : vector<8x32xf32> to vector<8x8xf32>
    %111 = arith.truncf %110 : vector<8x8xf32> to vector<8x8xbf16>
    %cst_43 = arith.constant dense<0.000000e+00> : vector<8x8xf32>
    %112 = tpu.matmul %109, %111, %cst_43 {dimension_numbers = #tpu.dot_dimension_numbers<[1], [1], [0], [0], [0, 0, 1, 0], [], []>} : vector<8x8xbf16>, vector<8x8xbf16>, vector<8x8xf32> -> vector<8x8xf32>
    %cst_44 = arith.constant dense<0xFF800000> : vector<8xf32>
    %113 = vector.multi_reduction <maximumf>, %112, %cst_44 [1] : vector<8x8xf32> to vector<8xf32>
    %114 = vector.shape_cast %113 : vector<8xf32> to vector<8x1xf32>
    %115 = vector.broadcast %114 : vector<8x1xf32> to vector<8x8xf32>
    %116 = arith.subf %112, %115 : vector<8x8xf32>
    %117 = math.exp %116 : vector<8x8xf32>
    %cst_45 = arith.constant dense<0.000000e+00> : vector<8xf32>
    %118 = vector.multi_reduction <add>, %117, %cst_45 [1] : vector<8x8xf32> to vector<8xf32>
    %119 = vector.shape_cast %118 : vector<8xf32> to vector<8x1xf32>
    %120 = tpu.reciprocal %119 {approx = true} : vector<8x1xf32> -> vector<8x1xf32>
    %121 = arith.mulf %119, %120 : vector<8x1xf32>
    %cst_46 = arith.constant 2.000000e+00 : f32
    %122 = vector.broadcast %cst_46 : f32 to vector<8x1xf32>
    %123 = arith.subf %122, %121 : vector<8x1xf32>
    %124 = arith.mulf %120, %123 : vector<8x1xf32>
    %125 = vector.broadcast %124 : vector<8x1xf32> to vector<8x8xf32>
    %126 = arith.mulf %117, %125 : vector<8x8xf32>
    %127 = arith.truncf %126 : vector<8x8xf32> to vector<8x8xbf16>
    %128 = vector.extract_strided_slice %30 {offsets = [0, 24], sizes = [8, 8], strides = [1, 1]} : vector<8x32xbf16> to vector<8x8xbf16>
    %cst_47 = arith.constant dense<0.000000e+00> : vector<8x8xf32>
    %129 = tpu.matmul %127, %128, %cst_47 {dimension_numbers = #tpu.dot_dimension_numbers<[1], [0], [0], [1], [0, 0, 1, 1], [], []>} : vector<8x8xbf16>, vector<8x8xbf16>, vector<8x8xf32> -> vector<8x8xf32>
    %c0_48 = arith.constant 0 : index
    %c24 = arith.constant 24 : index
    %130 = vector.load %arg12[%c0_48, %c24] : memref<8x32xf32, #tpu.memory_space<vmem>>, vector<8x8xf32>
    tpu.vector_store %arg12[%c0_48, %c24], %129 {strides = array<i32>} : memref<8x32xf32, #tpu.memory_space<vmem>>, vector<8x8xf32>,
    %c0_49 = arith.constant 0 : index
    %c0_50 = arith.constant 0 : index
    %131 = vector.load %arg12[%c0_49, %c0_50] : memref<8x32xf32, #tpu.memory_space<vmem>>, vector<8x32xf32>
    %132 = arith.truncf %131 : vector<8x32xf32> to vector<8x32xbf16>
    %cst_51 = arith.constant dense<0.000000e+00> : vector<8x32xf32>
    %133 = tpu.matmul %132, %14, %cst_51 {dimension_numbers = #tpu.dot_dimension_numbers<[1], [0], [0], [1], [0, 0, 1, 1], [], []>} : vector<8x32xbf16>, vector<32x32xbf16>, vector<8x32xf32> -> vector<8x32xf32>
    %c0_52 = arith.constant 0 : index
    %c0_53 = arith.constant 0 : index
    %134 = vector.load %arg10[%c0_52, %c0_53] : memref<1x32xf32, #tpu.memory_space<vmem>>, vector<1x32xf32>
    %135 = vector.broadcast %134 : vector<1x32xf32> to vector<8x32xf32>
    %136 = arith.addf %133, %135 : vector<8x32xf32>
    %c0_54 = arith.constant 0 : index
    %c0_55 = arith.constant 0 : index
    %c0_56 = arith.constant 0 : index
    %137 = vector.load %arg11[%c0_54, %c0_55, %c0_56] : memref<1x8x32xf32, #tpu.memory_space<vmem>>, vector<1x8x32xf32>
    %138 = vector.shape_cast %137 : vector<1x8x32xf32> to vector<8x32xf32>
    %139 = vector.shape_cast %136 : vector<8x32xf32> to vector<1x8x32xf32>
    tpu.vector_store %arg11[%c0_54, %c0_55, %c0_56], %139 {strides = array<i32>} : memref<1x8x32xf32, #tpu.memory_space<vmem>>, vector<1x8x32xf32>,
    return
  }
  func.func @transform_0(%arg0: i32, %arg1: i32) -> (i32, i32, i32) {
    %c0_i32 = arith.constant 0 : i32
    %c0_i32_0 = arith.constant 0 : i32
    %c0_i32_1 = arith.constant 0 : i32
    return %arg0, %c0_i32, %c0_i32_0 : i32, i32, i32
  }
  func.func @transform_1(%arg0: i32, %arg1: i32) -> (i32, i32) {
    %c0_i32 = arith.constant 0 : i32
    %c0_i32_0 = arith.constant 0 : i32
    %c0_i32_1 = arith.constant 0 : i32
    return %c0_i32, %c0_i32_0 : i32, i32
  }
  func.func @transform_2(%arg0: i32, %arg1: i32) -> (i32, i32) {
    %c0_i32 = arith.constant 0 : i32
    %c0_i32_0 = arith.constant 0 : i32
    %c0_i32_1 = arith.constant 0 : i32
    return %c0_i32, %c0_i32_0 : i32, i32
  }
  func.func @transform_3(%arg0: i32, %arg1: i32) -> (i32, i32) {
    %c0_i32 = arith.constant 0 : i32
    %c0_i32_0 = arith.constant 0 : i32
    %c0_i32_1 = arith.constant 0 : i32
    return %c0_i32, %c0_i32_0 : i32, i32
  }
  func.func @transform_4(%arg0: i32, %arg1: i32) -> (i32, i32) {
    %c0_i32 = arith.constant 0 : i32
    %c0_i32_0 = arith.constant 0 : i32
    %c0_i32_1 = arith.constant 0 : i32
    return %c0_i32, %c0_i32_0 : i32, i32
  }
  func.func @transform_5(%arg0: i32, %arg1: i32) -> (i32, i32) {
    %c0_i32 = arith.constant 0 : i32
    %c0_i32_0 = arith.constant 0 : i32
    %c0_i32_1 = arith.constant 0 : i32
    return %c0_i32, %c0_i32_0 : i32, i32
  }
  func.func @transform_6(%arg0: i32, %arg1: i32) -> (i32, i32) {
    %c0_i32 = arith.constant 0 : i32
    %c0_i32_0 = arith.constant 0 : i32
    %c0_i32_1 = arith.constant 0 : i32
    return %c0_i32, %c0_i32_0 : i32, i32
  }
  func.func @transform_7(%arg0: i32, %arg1: i32) -> (i32, i32) {
    %c0_i32 = arith.constant 0 : i32
    %c0_i32_0 = arith.constant 0 : i32
    %c0_i32_1 = arith.constant 0 : i32
    return %c0_i32, %c0_i32_0 : i32, i32
  }
  func.func @transform_8(%arg0: i32, %arg1: i32) -> (i32, i32) {
    %c0_i32 = arith.constant 0 : i32
    %c0_i32_0 = arith.constant 0 : i32
    %c0_i32_1 = arith.constant 0 : i32
    return %c0_i32, %c0_i32_0 : i32, i32
  }
  func.func @transform_9(%arg0: i32, %arg1: i32) -> (i32, i32, i32) {
    %c0_i32 = arith.constant 0 : i32
    %c0_i32_0 = arith.constant 0 : i32
    return %arg0, %arg1, %c0_i32 : i32, i32, i32
  }
}

module attributes {stable_mosaic.version = 11 : i64} {
  func.func @_fused_mha_kernel(%arg0: i32, %arg1: i32, %arg2: memref<1x8x32xf32, #tpu.memory_space<vmem>>, %arg3: memref<32x32xf32, #tpu.memory_space<vmem>>, %arg4: memref<1x32xf32, #tpu.memory_space<vmem>>, %arg5: memref<32x32xf32, #tpu.memory_space<vmem>>, %arg6: memref<1x32xf32, #tpu.memory_space<vmem>>, %arg7: memref<32x32xf32, #tpu.memory_space<vmem>>, %arg8: memref<1x32xf32, #tpu.memory_space<vmem>>, %arg9: memref<32x32xf32, #tpu.memory_space<vmem>>, %arg10: memref<1x32xf32, #tpu.memory_space<vmem>>, %arg11: memref<1x8x32xf32, #tpu.memory_space<vmem>>, %arg12: memref<8x32xf32, #tpu.memory_space<vmem>>) attributes {dimension_semantics = [#tpu.dimension_semantics<parallel>, #tpu.dimension_semantics<parallel>], iteration_bounds = array<i64: 2, 1>, scalar_prefetch = 0 : i64, scratch_operands = 1 : i64, tpu.core_type = #tpu.core_type<tc>, window_params = [{transform_indices = @transform_0, window_bounds = array<i64: 1, 8, 32>}, {pipeline_mode = #tpu.pipeline_mode<synchronous>, transform_indices = @transform_1, window_bounds = array<i64: 32, 32>}, {pipeline_mode = #tpu.pipeline_mode<synchronous>, transform_indices = @transform_2, window_bounds = array<i64: 1, 32>}, {pipeline_mode = #tpu.pipeline_mode<synchronous>, transform_indices = @transform_3, window_bounds = array<i64: 32, 32>}, {pipeline_mode = #tpu.pipeline_mode<synchronous>, transform_indices = @transform_4, window_bounds = array<i64: 1, 32>}, {pipeline_mode = #tpu.pipeline_mode<synchronous>, transform_indices = @transform_5, window_bounds = array<i64: 32, 32>}, {pipeline_mode = #tpu.pipeline_mode<synchronous>, transform_indices = @transform_6, window_bounds = array<i64: 1, 32>}, {pipeline_mode = #tpu.pipeline_mode<synchronous>, transform_indices = @transform_7, window_bounds = array<i64: 32, 32>}, {pipeline_mode = #tpu.pipeline_mode<synchronous>, transform_indices = @transform_8, window_bounds = array<i64: 1, 32>}, {transform_indices = @transform_9, window_bounds = array<i64: 1, 8, 32>}]} {
    %c8_i32 = arith.constant 8 : i32
    %0 = arith.muli %arg1, %c8_i32 : i32
    %1 = tpu.assume_multiple %0, 8 : i32
    %c0 = arith.constant 0 : index
    %2 = arith.index_cast %1 : i32 to index
    %c0_0 = arith.constant 0 : index
    %3 = vector.load %arg2[%c0, %2, %c0_0] : memref<1x8x32xf32, #tpu.memory_space<vmem>>, vector<1x8x32xf32>
    %4 = vector.shape_cast %3 : vector<1x8x32xf32> to vector<8x32xf32>
    %c0_1 = arith.constant 0 : index
    %c0_2 = arith.constant 0 : index
    %c0_3 = arith.constant 0 : index
    %5 = vector.load %arg2[%c0_1, %c0_2, %c0_3] : memref<1x8x32xf32, #tpu.memory_space<vmem>>, vector<1x8x32xf32>
    %6 = vector.shape_cast %5 : vector<1x8x32xf32> to vector<8x32xf32>
    %c0_4 = arith.constant 0 : index
    %c0_5 = arith.constant 0 : index
    %7 = vector.load %arg3[%c0_4, %c0_5] : memref<32x32xf32, #tpu.memory_space<vmem>>, vector<32x32xf32>
    %8 = arith.truncf %7 : vector<32x32xf32> to vector<32x32xbf16>
    %c0_6 = arith.constant 0 : index
    %c0_7 = arith.constant 0 : index
    %9 = vector.load %arg5[%c0_6, %c0_7] : memref<32x32xf32, #tpu.memory_space<vmem>>, vector<32x32xf32>
    %10 = arith.truncf %9 : vector<32x32xf32> to vector<32x32xbf16>
    %c0_8 = arith.constant 0 : index
    %c0_9 = arith.constant 0 : index
    %11 = vector.load %arg7[%c0_8, %c0_9] : memref<32x32xf32, #tpu.memory_space<vmem>>, vector<32x32xf32>
    %12 = arith.truncf %11 : vector<32x32xf32> to vector<32x32xbf16>
    %c0_10 = arith.constant 0 : index
    %c0_11 = arith.constant 0 : index
    %13 = vector.load %arg9[%c0_10, %c0_11] : memref<32x32xf32, #tpu.memory_space<vmem>>, vector<32x32xf32>
    %14 = arith.truncf %13 : vector<32x32xf32> to vector<32x32xbf16>
    %15 = arith.truncf %4 : vector<8x32xf32> to vector<8x32xbf16>
    %cst = arith.constant dense<0.000000e+00> : vector<8x32xf32>
    %16 = tpu.matmul %15, %8, %cst {dimension_numbers = #tpu.dot_dimension_numbers<[1], [0], [0], [1], [0, 0, 1, 1], [], []>} : vector<8x32xbf16>, vector<32x32xbf16>, vector<8x32xf32> -> vector<8x32xf32>
    %c0_12 = arith.constant 0 : index
    %c0_13 = arith.constant 0 : index
    %17 = vector.load %arg4[%c0_12, %c0_13] : memref<1x32xf32, #tpu.memory_space<vmem>>, vector<1x32xf32>
    %18 = vector.broadcast %17 : vector<1x32xf32> to vector<8x32xf32>
    %19 = arith.addf %16, %18 : vector<8x32xf32>
    %20 = arith.truncf %6 : vector<8x32xf32> to vector<8x32xbf16>
    %cst_14 = arith.constant dense<0.000000e+00> : vector<8x32xf32>
    %21 = tpu.matmul %20, %10, %cst_14 {dimension_numbers = #tpu.dot_dimension_numbers<[1], [0], [0], [1], [0, 0, 1, 1], [], []>} : vector<8x32xbf16>, vector<32x32xbf16>, vector<8x32xf32> -> vector<8x32xf32>
    %c0_15 = arith.constant 0 : index
    %c0_16 = arith.constant 0 : index
    %22 = vector.load %arg6[%c0_15, %c0_16] : memref<1x32xf32, #tpu.memory_space<vmem>>, vector<1x32xf32>
    %23 = vector.broadcast %22 : vector<1x32xf32> to vector<8x32xf32>
    %24 = arith.addf %21, %23 : vector<8x32xf32>
    %25 = arith.truncf %6 : vector<8x32xf32> to vector<8x32xbf16>
    %cst_17 = arith.constant dense<0.000000e+00> : vector<8x32xf32>
    %26 = tpu.matmul %25, %12, %cst_17 {dimension_numbers = #tpu.dot_dimension_numbers<[1], [0], [0], [1], [0, 0, 1, 1], [], []>} : vector<8x32xbf16>, vector<32x32xbf16>, vector<8x32xf32> -> vector<8x32xf32>
    %c0_18 = arith.constant 0 : index
    %c0_19 = arith.constant 0 : index
    %27 = vector.load %arg8[%c0_18, %c0_19] : memref<1x32xf32, #tpu.memory_space<vmem>>, vector<1x32xf32>
    %28 = vector.broadcast %27 : vector<1x32xf32> to vector<8x32xf32>
    %29 = arith.addf %26, %28 : vector<8x32xf32>
    %30 = arith.truncf %29 : vector<8x32xf32> to vector<8x32xbf16>
    %31 = vector.extract_strided_slice %19 {offsets = [0, 0], sizes = [8, 8], strides = [1, 1]} : vector<8x32xf32> to vector<8x8xf32>
    %cst_20 = arith.constant 0.353553385 : f32
    %32 = vector.broadcast %cst_20 : f32 to vector<8x8xf32>
    %33 = arith.mulf %31, %32 : vector<8x8xf32>
    %34 = arith.truncf %33 : vector<8x8xf32> to vector<8x8xbf16>
    %35 = vector.extract_strided_slice %24 {offsets = [0, 0], sizes = [8, 8], strides = [1, 1]} : vector<8x32xf32> to vector<8x8xf32>
    %36 = arith.truncf %35 : vector<8x8xf32> to vector<8x8xbf16>
    %cst_21 = arith.constant dense<0.000000e+00> : vector<8x8xf32>
    %37 = tpu.matmul %34, %36, %cst_21 {dimension_numbers = #tpu.dot_dimension_numbers<[1], [1], [0], [0], [0, 0, 1, 0], [], []>} : vector<8x8xbf16>, vector<8x8xbf16>, vector<8x8xf32> -> vector<8x8xf32>
    %cst_22 = arith.constant dense<0xFF800000> : vector<8xf32>
    %38 = vector.multi_reduction <maximumf>, %37, %cst_22 [1] : vector<8x8xf32> to vector<8xf32>
    %39 = vector.shape_cast %38 : vector<8xf32> to vector<8x1xf32>
    %40 = vector.broadcast %39 : vector<8x1xf32> to vector<8x8xf32>
    %41 = arith.subf %37, %40 : vector<8x8xf32>
    %42 = math.exp %41 : vector<8x8xf32>
    %cst_23 = arith.constant dense<0.000000e+00> : vector<8xf32>
    %43 = vector.multi_reduction <add>, %42, %cst_23 [1] : vector<8x8xf32> to vector<8xf32>
    %44 = vector.shape_cast %43 : vector<8xf32> to vector<8x1xf32>
    %45 = tpu.reciprocal %44 {approx = true} : vector<8x1xf32> -> vector<8x1xf32>
    %46 = arith.mulf %44, %45 : vector<8x1xf32>
    %cst_24 = arith.constant 2.000000e+00 : f32
    %47 = vector.broadcast %cst_24 : f32 to vector<8x1xf32>
    %48 = arith.subf %47, %46 : vector<8x1xf32>
    %49 = arith.mulf %45, %48 : vector<8x1xf32>
    %50 = vector.broadcast %49 : vector<8x1xf32> to vector<8x8xf32>
    %51 = arith.mulf %42, %50 : vector<8x8xf32>
    %52 = arith.truncf %51 : vector<8x8xf32> to vector<8x8xbf16>
    %53 = vector.extract_strided_slice %30 {offsets = [0, 0], sizes = [8, 8], strides = [1, 1]} : vector<8x32xbf16> to vector<8x8xbf16>
    %cst_25 = arith.constant dense<0.000000e+00> : vector<8x8xf32>
    %54 = tpu.matmul %52, %53, %cst_25 {dimension_numbers = #tpu.dot_dimension_numbers<[1], [0], [0], [1], [0, 0, 1, 1], [], []>} : vector<8x8xbf16>, vector<8x8xbf16>, vector<8x8xf32> -> vector<8x8xf32>
    %c0_26 = arith.constant 0 : index
    %c0_27 = arith.constant 0 : index
    %55 = vector.load %arg12[%c0_26, %c0_27] : memref<8x32xf32, #tpu.memory_space<vmem>>, vector<8x8xf32>
    tpu.vector_store %arg12[%c0_26, %c0_27], %54 {strides = array<i32>} : memref<8x32xf32, #tpu.memory_space<vmem>>, vector<8x8xf32>,
    %56 = vector.extract_strided_slice %19 {offsets = [0, 8], sizes = [8, 8], strides = [1, 1]} : vector<8x32xf32> to vector<8x8xf32>
    %cst_28 = arith.constant 0.353553385 : f32
    %57 = vector.broadcast %cst_28 : f32 to vector<8x8xf32>
    %58 = arith.mulf %56, %57 : vector<8x8xf32>
    %59 = arith.truncf %58 : vector<8x8xf32> to vector<8x8xbf16>
    %60 = vector.extract_strided_slice %24 {offsets = [0, 8], sizes = [8, 8], strides = [1, 1]} : vector<8x32xf32> to vector<8x8xf32>
    %61 = arith.truncf %60 : vector<8x8xf32> to vector<8x8xbf16>
    %cst_29 = arith.constant dense<0.000000e+00> : vector<8x8xf32>
    %62 = tpu.matmul %59, %61, %cst_29 {dimension_numbers = #tpu.dot_dimension_numbers<[1], [1], [0], [0], [0, 0, 1, 0], [], []>} : vector<8x8xbf16>, vector<8x8xbf16>, vector<8x8xf32> -> vector<8x8xf32>
    %cst_30 = arith.constant dense<0xFF800000> : vector<8xf32>
    %63 = vector.multi_reduction <maximumf>, %62, %cst_30 [1] : vector<8x8xf32> to vector<8xf32>
    %64 = vector.shape_cast %63 : vector<8xf32> to vector<8x1xf32>
    %65 = vector.broadcast %64 : vector<8x1xf32> to vector<8x8xf32>
    %66 = arith.subf %62, %65 : vector<8x8xf32>
    %67 = math.exp %66 : vector<8x8xf32>
    %cst_31 = arith.constant dense<0.000000e+00> : vector<8xf32>
    %68 = vector.multi_reduction <add>, %67, %cst_31 [1] : vector<8x8xf32> to vector<8xf32>
    %69 = vector.shape_cast %68 : vector<8xf32> to vector<8x1xf32>
    %70 = tpu.reciprocal %69 {approx = true} : vector<8x1xf32> -> vector<8x1xf32>
    %71 = arith.mulf %69, %70 : vector<8x1xf32>
    %cst_32 = arith.constant 2.000000e+00 : f32
    %72 = vector.broadcast %cst_32 : f32 to vector<8x1xf32>
    %73 = arith.subf %72, %71 : vector<8x1xf32>
    %74 = arith.mulf %70, %73 : vector<8x1xf32>
    %75 = vector.broadcast %74 : vector<8x1xf32> to vector<8x8xf32>
    %76 = arith.mulf %67, %75 : vector<8x8xf32>
    %77 = arith.truncf %76 : vector<8x8xf32> to vector<8x8xbf16>
    %78 = vector.extract_strided_slice %30 {offsets = [0, 8], sizes = [8, 8], strides = [1, 1]} : vector<8x32xbf16> to vector<8x8xbf16>
    %cst_33 = arith.constant dense<0.000000e+00> : vector<8x8xf32>
    %79 = tpu.matmul %77, %78, %cst_33 {dimension_numbers = #tpu.dot_dimension_numbers<[1], [0], [0], [1], [0, 0, 1, 1], [], []>} : vector<8x8xbf16>, vector<8x8xbf16>, vector<8x8xf32> -> vector<8x8xf32>
    %c0_34 = arith.constant 0 : index
    %c8 = arith.constant 8 : index
    %80 = vector.load %arg12[%c0_34, %c8] : memref<8x32xf32, #tpu.memory_space<vmem>>, vector<8x8xf32>
    tpu.vector_store %arg12[%c0_34, %c8], %79 {strides = array<i32>} : memref<8x32xf32, #tpu.memory_space<vmem>>, vector<8x8xf32>,
    %81 = vector.extract_strided_slice %19 {offsets = [0, 16], sizes = [8, 8], strides = [1, 1]} : vector<8x32xf32> to vector<8x8xf32>
    %cst_35 = arith.constant 0.353553385 : f32
    %82 = vector.broadcast %cst_35 : f32 to vector<8x8xf32>
    %83 = arith.mulf %81, %82 : vector<8x8xf32>
    %84 = arith.truncf %83 : vector<8x8xf32> to vector<8x8xbf16>
    %85 = vector.extract_strided_slice %24 {offsets = [0, 16], sizes = [8, 8], strides = [1, 1]} : vector<8x32xf32> to vector<8x8xf32>
    %86 = arith.truncf %85 : vector<8x8xf32> to vector<8x8xbf16>
    %cst_36 = arith.constant dense<0.000000e+00> : vector<8x8xf32>
    %87 = tpu.matmul %84, %86, %cst_36 {dimension_numbers = #tpu.dot_dimension_numbers<[1], [1], [0], [0], [0, 0, 1, 0], [], []>} : vector<8x8xbf16>, vector<8x8xbf16>, vector<8x8xf32> -> vector<8x8xf32>
    %cst_37 = arith.constant dense<0xFF800000> : vector<8xf32>
    %88 = vector.multi_reduction <maximumf>, %87, %cst_37 [1] : vector<8x8xf32> to vector<8xf32>
    %89 = vector.shape_cast %88 : vector<8xf32> to vector<8x1xf32>
    %90 = vector.broadcast %89 : vector<8x1xf32> to vector<8x8xf32>
    %91 = arith.subf %87, %90 : vector<8x8xf32>
    %92 = math.exp %91 : vector<8x8xf32>
    %cst_38 = arith.constant dense<0.000000e+00> : vector<8xf32>
    %93 = vector.multi_reduction <add>, %92, %cst_38 [1] : vector<8x8xf32> to vector<8xf32>
    %94 = vector.shape_cast %93 : vector<8xf32> to vector<8x1xf32>
    %95 = tpu.reciprocal %94 {approx = true} : vector<8x1xf32> -> vector<8x1xf32>
    %96 = arith.mulf %94, %95 : vector<8x1xf32>
    %cst_39 = arith.constant 2.000000e+00 : f32
    %97 = vector.broadcast %cst_39 : f32 to vector<8x1xf32>
    %98 = arith.subf %97, %96 : vector<8x1xf32>
    %99 = arith.mulf %95, %98 : vector<8x1xf32>
    %100 = vector.broadcast %99 : vector<8x1xf32> to vector<8x8xf32>
    %101 = arith.mulf %92, %100 : vector<8x8xf32>
    %102 = arith.truncf %101 : vector<8x8xf32> to vector<8x8xbf16>
    %103 = vector.extract_strided_slice %30 {offsets = [0, 16], sizes = [8, 8], strides = [1, 1]} : vector<8x32xbf16> to vector<8x8xbf16>
    %cst_40 = arith.constant dense<0.000000e+00> : vector<8x8xf32>
    %104 = tpu.matmul %102, %103, %cst_40 {dimension_numbers = #tpu.dot_dimension_numbers<[1], [0], [0], [1], [0, 0, 1, 1], [], []>} : vector<8x8xbf16>, vector<8x8xbf16>, vector<8x8xf32> -> vector<8x8xf32>
    %c0_41 = arith.constant 0 : index
    %c16 = arith.constant 16 : index
    %105 = vector.load %arg12[%c0_41, %c16] : memref<8x32xf32, #tpu.memory_space<vmem>>, vector<8x8xf32>
    tpu.vector_store %arg12[%c0_41, %c16], %104 {strides = array<i32>} : memref<8x32xf32, #tpu.memory_space<vmem>>, vector<8x8xf32>,
    %106 = vector.extract_strided_slice %19 {offsets = [0, 24], sizes = [8, 8], strides = [1, 1]} : vector<8x32xf32> to vector<8x8xf32>
    %cst_42 = arith.constant 0.353553385 : f32
    %107 = vector.broadcast %cst_42 : f32 to vector<8x8xf32>
    %108 = arith.mulf %106, %107 : vector<8x8xf32>
    %109 = arith.truncf %108 : vector<8x8xf32> to vector<8x8xbf16>
    %110 = vector.extract_strided_slice %24 {offsets = [0, 24], sizes = [8, 8], strides = [1, 1]} : vector<8x32xf32> to vector<8x8xf32>
    %111 = arith.truncf %110 : vector<8x8xf32> to vector<8x8xbf16>
    %cst_43 = arith.constant dense<0.000000e+00> : vector<8x8xf32>
    %112 = tpu.matmul %109, %111, %cst_43 {dimension_numbers = #tpu.dot_dimension_numbers<[1], [1], [0], [0], [0, 0, 1, 0], [], []>} : vector<8x8xbf16>, vector<8x8xbf16>, vector<8x8xf32> -> vector<8x8xf32>
    %cst_44 = arith.constant dense<0xFF800000> : vector<8xf32>
    %113 = vector.multi_reduction <maximumf>, %112, %cst_44 [1] : vector<8x8xf32> to vector<8xf32>
    %114 = vector.shape_cast %113 : vector<8xf32> to vector<8x1xf32>
    %115 = vector.broadcast %114 : vector<8x1xf32> to vector<8x8xf32>
    %116 = arith.subf %112, %115 : vector<8x8xf32>
    %117 = math.exp %116 : vector<8x8xf32>
    %cst_45 = arith.constant dense<0.000000e+00> : vector<8xf32>
    %118 = vector.multi_reduction <add>, %117, %cst_45 [1] : vector<8x8xf32> to vector<8xf32>
    %119 = vector.shape_cast %118 : vector<8xf32> to vector<8x1xf32>
    %120 = tpu.reciprocal %119 {approx = true} : vector<8x1xf32> -> vector<8x1xf32>
    %121 = arith.mulf %119, %120 : vector<8x1xf32>
    %cst_46 = arith.constant 2.000000e+00 : f32
    %122 = vector.broadcast %cst_46 : f32 to vector<8x1xf32>
    %123 = arith.subf %122, %121 : vector<8x1xf32>
    %124 = arith.mulf %120, %123 : vector<8x1xf32>
    %125 = vector.broadcast %124 : vector<8x1xf32> to vector<8x8xf32>
    %126 = arith.mulf %117, %125 : vector<8x8xf32>
    %127 = arith.truncf %126 : vector<8x8xf32> to vector<8x8xbf16>
    %128 = vector.extract_strided_slice %30 {offsets = [0, 24], sizes = [8, 8], strides = [1, 1]} : vector<8x32xbf16> to vector<8x8xbf16>
    %cst_47 = arith.constant dense<0.000000e+00> : vector<8x8xf32>
    %129 = tpu.matmul %127, %128, %cst_47 {dimension_numbers = #tpu.dot_dimension_numbers<[1], [0], [0], [1], [0, 0, 1, 1], [], []>} : vector<8x8xbf16>, vector<8x8xbf16>, vector<8x8xf32> -> vector<8x8xf32>
    %c0_48 = arith.constant 0 : index
    %c24 = arith.constant 24 : index
    %130 = vector.load %arg12[%c0_48, %c24] : memref<8x32xf32, #tpu.memory_space<vmem>>, vector<8x8xf32>
    tpu.vector_store %arg12[%c0_48, %c24], %129 {strides = array<i32>} : memref<8x32xf32, #tpu.memory_space<vmem>>, vector<8x8xf32>,
    %c0_49 = arith.constant 0 : index
    %c0_50 = arith.constant 0 : index
    %131 = vector.load %arg12[%c0_49, %c0_50] : memref<8x32xf32, #tpu.memory_space<vmem>>, vector<8x32xf32>
    %132 = arith.truncf %131 : vector<8x32xf32> to vector<8x32xbf16>
    %cst_51 = arith.constant dense<0.000000e+00> : vector<8x32xf32>
    %133 = tpu.matmul %132, %14, %cst_51 {dimension_numbers = #tpu.dot_dimension_numbers<[1], [0], [0], [1], [0, 0, 1, 1], [], []>} : vector<8x32xbf16>, vector<32x32xbf16>, vector<8x32xf32> -> vector<8x32xf32>
    %c0_52 = arith.constant 0 : index
    %c0_53 = arith.constant 0 : index
    %134 = vector.load %arg10[%c0_52, %c0_53] : memref<1x32xf32, #tpu.memory_space<vmem>>, vector<1x32xf32>
    %135 = vector.broadcast %134 : vector<1x32xf32> to vector<8x32xf32>
    %136 = arith.addf %133, %135 : vector<8x32xf32>
    %c0_54 = arith.constant 0 : index
    %c0_55 = arith.constant 0 : index
    %c0_56 = arith.constant 0 : index
    %137 = vector.load %arg11[%c0_54, %c0_55, %c0_56] : memref<1x8x32xf32, #tpu.memory_space<vmem>>, vector<1x8x32xf32>
    %138 = vector.shape_cast %137 : vector<1x8x32xf32> to vector<8x32xf32>
    %139 = vector.shape_cast %136 : vector<8x32xf32> to vector<1x8x32xf32>
    tpu.vector_store %arg11[%c0_54, %c0_55, %c0_56], %139 {strides = array<i32>} : memref<1x8x32xf32, #tpu.memory_space<vmem>>, vector<1x8x32xf32>,
    return
  }
  func.func @transform_0(%arg0: i32, %arg1: i32) -> (i32, i32, i32) {
    %c0_i32 = arith.constant 0 : i32
    %c0_i32_0 = arith.constant 0 : i32
    %c0_i32_1 = arith.constant 0 : i32
    return %arg0, %c0_i32, %c0_i32_0 : i32, i32, i32
  }
  func.func @transform_1(%arg0: i32, %arg1: i32) -> (i32, i32) {
    %c0_i32 = arith.constant 0 : i32
    %c0_i32_0 = arith.constant 0 : i32
    %c0_i32_1 = arith.constant 0 : i32
    return %c0_i32, %c0_i32_0 : i32, i32
  }
  func.func @transform_2(%arg0: i32, %arg1: i32) -> (i32, i32) {
    %c0_i32 = arith.constant 0 : i32
    %c0_i32_0 = arith.constant 0 : i32
    %c0_i32_1 = arith.constant 0 : i32
    return %c0_i32, %c0_i32_0 : i32, i32
  }
  func.func @transform_3(%arg0: i32, %arg1: i32) -> (i32, i32) {
    %c0_i32 = arith.constant 0 : i32
    %c0_i32_0 = arith.constant 0 : i32
    %c0_i32_1 = arith.constant 0 : i32
    return %c0_i32, %c0_i32_0 : i32, i32
  }
  func.func @transform_4(%arg0: i32, %arg1: i32) -> (i32, i32) {
    %c0_i32 = arith.constant 0 : i32
    %c0_i32_0 = arith.constant 0 : i32
    %c0_i32_1 = arith.constant 0 : i32
    return %c0_i32, %c0_i32_0 : i32, i32
  }
  func.func @transform_5(%arg0: i32, %arg1: i32) -> (i32, i32) {
    %c0_i32 = arith.constant 0 : i32
    %c0_i32_0 = arith.constant 0 : i32
    %c0_i32_1 = arith.constant 0 : i32
    return %c0_i32, %c0_i32_0 : i32, i32
  }
  func.func @transform_6(%arg0: i32, %arg1: i32) -> (i32, i32) {
    %c0_i32 = arith.constant 0 : i32
    %c0_i32_0 = arith.constant 0 : i32
    %c0_i32_1 = arith.constant 0 : i32
    return %c0_i32, %c0_i32_0 : i32, i32
  }
  func.func @transform_7(%arg0: i32, %arg1: i32) -> (i32, i32) {
    %c0_i32 = arith.constant 0 : i32
    %c0_i32_0 = arith.constant 0 : i32
    %c0_i32_1 = arith.constant 0 : i32
    return %c0_i32, %c0_i32_0 : i32, i32
  }
  func.func @transform_8(%arg0: i32, %arg1: i32) -> (i32, i32) {
    %c0_i32 = arith.constant 0 : i32
    %c0_i32_0 = arith.constant 0 : i32
    %c0_i32_1 = arith.constant 0 : i32
    return %c0_i32, %c0_i32_0 : i32, i32
  }
  func.func @transform_9(%arg0: i32, %arg1: i32) -> (i32, i32, i32) {
    %c0_i32 = arith.constant 0 : i32
    %c0_i32_0 = arith.constant 0 : i32
    return %arg0, %arg1, %c0_i32 : i32, i32, i32
  }
}

</mosaic_0001>

<bundles_post_ra>
// kernel: tpu_custom_call.1
= control target key start
LH: loop header
LB: loop body
LE: loop exit
PB: predicated region body
PF: predicated region fallthrough
CT: control target
= control target key end

     0   :  { %s1627_s0 = inlined_call_operand.hbm [shape: f32[2,8,32], index: 0, kind: input, shape index: {}]   ;;  %s1628_s1 = inlined_call_operand.hbm [shape: f32[32,32], index: 1, kind: input, shape index: {}]   ;;  %s1629_s2 = inlined_call_operand.vmem [shape: f32[1,32], index: 2, kind: input, shape index: {}]   ;;  %s1630_s3 = inlined_call_operand.hbm [shape: f32[32,32], index: 3, kind: input, shape index: {}]   ;;  %s1631_s4 = inlined_call_operand.vmem [shape: f32[1,32], index: 4, kind: input, shape index: {}]   ;;  %s1632_s5 = inlined_call_operand.hbm [shape: f32[32,32], index: 5, kind: input, shape index: {}]   ;;  %s1633_s6 = inlined_call_operand.vmem [shape: f32[1,32], index: 6, kind: input, shape index: {}]   ;;  %s1634_s7 = inlined_call_operand.hbm [shape: f32[32,32], index: 7, kind: input, shape index: {}]   ;;  %s1635_s8 = inlined_call_operand.vmem [shape: f32[1,32], index: 8, kind: input, shape index: {}]   ;;  %s1636_s9 = inlined_call_operand.hbm [shape: f32[2,8,32], index: 9, kind: output, shape index: {}]  }
   0x1   :  { %1638 = sst [smem:[#allocation17_spill]] %s1628_s1 }
   0x2   :  { %1639 = sst [smem:[#allocation18_spill]] %s1630_s3 }
   0x3   :  { %1640 = sst [smem:[#allocation19_spill]] %s1632_s5 }
   0x4   :  { %14 = vsyncpa [#allocation4], 0 }
   0x5   :  { %16 = vsyncpa [#allocation4 + $0x1], 0 }
   0x6   :  { %17 = vsyncpa [#allocation7], 0 }
   0x7   :  { %18 = vsyncpa [#allocation10], 0 }
   0x8   :  { %19 = vsyncpa [#allocation5], 0 }
   0x9   :  { %21 = vsyncpa [#allocation5 + $0x1], 0  ;;  %s1406_s30 = smov 0   ;;  %s1408_s10 = smov 0  }
   0xa   :  { %s1410_s11 = smov 0   ;;  %s1412_s12 = smov 0  }
   0xb   :  { %s1414_s13 = smov 0   ;;  %s1416_s14 = smov 0  }
   0xc LB: > { %s1637_s15 = sadd.s32 4294967295, %s1342_s14   ;;  %p940_p0 = scmp.ge.s32.totalorder %s1342_s14, 1  ;;  %s1342_s14 = sphi %s1416_s14, %s27_s14   ;;  %s1338_s13 = sphi %s1414_s13, %s1655_s13   ;;  %s1334_s12 = sphi %s1412_s12, %s1654_s12   ;;  %s1330_s11 = sphi %s1410_s11, %s1653_s11   ;;  %s1326_s10 = sphi %s1408_s10, %s1652_s10   ;;  %s1322_s30 = sphi %s1406_s30, %s1651_s30  }
   0xd   : > { %p1440_p1 = scmp.eq.s32.totalorder %s1637_s15, 0  ;;  %p266_p2 = scmp.lt.s32.totalorder %s1342_s14, 3 }
   0xe   : > { %s1642_s1 = sld [smem:[#allocation17_spill]]  ;;  %s1344_s21 = smov [#allocation6]  }
   0xf   : > { %p1448_p3 = pnand %p940_p0, %p266_p2  ;;  %s279_s22 = sshll.u32 %s1344_s21, 4  ;;  %s280_s22 = int_to_ptr.vmem [resolvable:$true] %s279_s22 }
  0x10   : > { %p945_p6 = scmp.ge.s32.totalorder %s1342_s14, 2  ;;  %s1645_s5 = sld [smem:[#allocation19_spill]] }
  0x11   : > { %p991_p4 = pneg %p1448_p3  ;;  %s1345_s27 = smov 128  }
  0x12   : > { %s1346_s28 = smov 8   ;;  %s1347_s29 = smov [#allocation9]  }
  0x13   : > { %p1456_p5 = pnand %p991_p4, %p1440_p1  ;;  %s313_s17 = sshll.u32 %s1347_s29, 4  ;;  %s314_s17 = int_to_ptr.vmem [resolvable:$true] %s313_s17 }
  0x14   : > { %s277_s19 = sshll.u32 %s1642_s1, 4  ;;  %s1646_s3 = sld [smem:[#allocation18_spill]]  ;;  %s278_s19 = int_to_ptr.hbm [resolvable:$true] %s277_s19 }
  0x15   : > { %994 = dma.hbm_to_vmem [thread:$0]  (!%p1456_p5), %s278_s19, 512, %s280_s22, [#allocation7], %s1345_s27, %s1345_s27, %s1346_s28  }
  0x16   : > { %s311_s26 = sshll.u32 %s1645_s5, 4  ;;  %s328_s19 = sshll.u32 %s1634_s7, 4  ;;  %s312_s26 = int_to_ptr.hbm [resolvable:$true] %s311_s26  ;;  %s329_s19 = int_to_ptr.hbm [resolvable:$true] %s328_s19 }
  0x17   : > { %1000 = dma.hbm_to_vmem [thread:$0]  (!%p1456_p5), %s312_s26, 512, %s314_s17, [#allocation10], %s1345_s27, %s1345_s27, %s1346_s28  }
  0x18   : > { %s1348_s22 = smov [#allocation8]   ;;  %s1349_s18 = smov [#allocation11]  }
  0x19   : > { %s296_s29 = sshll.u32 %s1348_s22, 4  ;;  %s330_s21 = sshll.u32 %s1349_s18, 4  ;;  %s297_s29 = int_to_ptr.vmem [resolvable:$true] %s296_s29  ;;  %s331_s21 = int_to_ptr.vmem [resolvable:$true] %s330_s21 }
  0x1a   : > { %s294_s15 = sshll.u32 %s1646_s3, 4  ;;  %s39_s26 = sadd.s32 1, %s1338_s13  ;;  %s295_s15 = int_to_ptr.hbm [resolvable:$true] %s294_s15 }
  0x1b   : > { %997 = dma.hbm_to_vmem [thread:$0]  (!%p1456_p5), %s295_s15, 512, %s297_s29, [#allocation7], %s1345_s27, %s1345_s27, %s1346_s28  }
  0x1c   : > { %1003 = dma.hbm_to_vmem [thread:$0]  (!%p1456_p5), %s329_s19, 512, %s331_s21, [#allocation10], %s1345_s27, %s1345_s27, %s1346_s28  }
  0x1d   : > { %s939_s17 = sadd.s32 4294967294, %s1342_s14   ;;  %p41_p7 = scmp.ge.s32.totalorder %s39_s26, 2 }
  0x1e   : > { %s46_s24 = sadd.s32 1, %s1330_s11  ;;  %p53_p8 = scmp.ne.s32.totalorder %s1330_s11, %s1326_s10 }
  0x1f   : > { %s1657_s26 = smov (%p41_p7, %s39_s26), 0  ;;  %p54_p9 = scmp.eq.s32.totalorder %s1342_s14, 0 }
  0x20   : > { %p59_p10 = scmp.ne.s32.totalorder %s1326_s10, %s1322_s30  ;;  %s43_s15 = ssub.s32 %s1338_s13, %s1657_s26 }
  0x21   : > { %s1647_s25 = sadd.s32 4294967295, %s1342_s14   ;;  %p44_p12 = scmp.eq.s32.totalorder %s43_s15, 0 }
  0x22   : > { %p253_p11 = scmp.eq.s32.totalorder %s1647_s25, 1  ;;  %p1494_p13 = por %p1440_p1, %p59_p10 }
  0x23   : > { %p259_p2 = scmp.eq.s32.totalorder %s939_s17, 1  ;;  %p55_p4 = por %p54_p9, %p53_p8 }
  0x24   : > { %p1498_p0 = por %p253_p11, %p53_p8  ;;  %s347_s22 = sand.u32 1, %s1330_s11  }
  0x25   : > { %s1503_s28 = scalar_select %p44_p12, %s1330_s11, %s46_s24  }
  0x26   : > { %p1505_p5 = por %p259_p2, %p59_p10  ;;  %s947_s29 = sshll.u32 %s1338_s13, 3 }
  0x27   : > { %p1016_p7 = scmp.lt.s32.totalorder %s1342_s14, 2  ;;  %s946_s18 = sshll.u32 %s347_s22, 3 }
  0x28   : > { %s355_s25 = scalar_lea.hbm %s1627_s0, %s947_s29  ;;  %s351_s3 = scalar_lea.vmem [#allocation3], %s946_s18 }
  0x29   : > { %s357_s1 = sshll.u32 %s355_s25, 4  ;;  %s359_s5 = sshll.u32 %s351_s3, 4  ;;  %s358_s1 = int_to_ptr.hbm [resolvable:$true] %s357_s1  ;;  %s360_s5 = int_to_ptr.vmem [resolvable:$true] %s359_s5 }
  0x2a   : > { %p1005_p11 = pnand %p1016_p7, %p55_p4  ;;  %s348_s17 = scalar_lea.sflag [#allocation4], %s347_s22 }
  0x2b   : > { %368 = sbr.rel (%p1448_p3) target bundleno = 1132 (0x46c), region = 56  ;;  %s1518_s24 = sand.u32 (!%p1448_p3), 1, %s1326_s10  }
  0x2c   : > { %1007 = dma.hbm_to_vmem [thread:$0]  (!%p1005_p11), %s358_s1, 128, %s360_s5, %s348_s17  }
  0x2d   : > { %s949_s21 = sshll.u32 (!%p1448_p3), %s1518_s24, 3  ;;  %s371_s29 = scalar_lea.sflag (!%p1448_p3), [#allocation4], %s1518_s24 }
  0x2e   : > { %s374_s18 = scalar_lea.vmem (!%p1448_p3), [#allocation3], %s949_s21 }
  0x30   : > { %1305 = dma.done.wait (%p1494_p13), %s371_s29, 128  }
  0x31   : > { %1307 = vsyncadd (%p1494_p13), %s371_s29, 4294967168 }
  0x32   : > { %1309 = dma.done.wait (%p1440_p1), [#allocation7], 1024  }
  0x33   : > { %1311 = vsyncadd (%p1440_p1), [#allocation7], 4294966272 }
  0x34   : > { %1313 = dma.done.wait (%p1440_p1), [#allocation10], 1024  }
  0x35   : > { %1315 = vsyncadd (%p1440_p1), [#allocation10], 4294966272  ;;  %v437_v0 = vld [vmem:[#allocation6 + $0x10] sm:$0xff]  ;;  %v438_v1 = vld [vmem:[#allocation6 + $0x18] sm:$0xff]  ;;  %vm464_vm0 = vcmask 261120   ;;  %vm523_vm1 = vcmask 64512  }
  0x36   : > { %v443_v2 = vld [vmem:[#allocation8 + $0x10] sm:$0xff]  ;;  %v440_v3 = vpack.c.bf16 %v438_v1, %v437_v0  ;;  %v444_v4 = vld [vmem:[#allocation8 + $0x18] sm:$0xff]  ;;  %v435_v5 = vld [vmem:[#allocation6] sm:$0xff]  ;;  %s1350_s20 = smov 112   ;;  %s1351_s23 = smov 120   ;;  %vm561_vm2 = vcmask 1043456  }
  0x37   : > { %v436_v6 = vld [vmem:[#allocation6 + $0x8] sm:$0xff]  ;;  %v446_v7 = vpack.c.bf16 %v444_v4, %v443_v2  ;;  %v441_v8 = vld [vmem:[#allocation8] sm:$0xff]  ;;  %v433_v11 = vld [vmem:[%s374_s18] sm:$0xff]  ;;  %s1352_s22 = smov 104   ;;  %s1353_s17 = smov 8   ;;  %vm647_vm3 = vcmask 130112  }
  0x38   : > { %v442_v9 = vld [vmem:[#allocation8 + $0x8] sm:$0xff]  ;;  %474 = vmatpush.bf16.msra.mxu0 %v440_v3  ;;  %v439_v10 = vpack.c.bf16 %v436_v6, %v435_v5  ;;  %v459_v13 = vpack.c.bf16 %v433_v11, %v433_v11  ;;  %v449_v38 = vld [vmem:[#allocation9 + $0x10] sm:$0xff]  ;;  %v450_v39 = vld [vmem:[#allocation9 + $0x18] sm:$0xff]  ;;  %s1354_s29 = smov 24   ;;  %s1355_s18 = smov 16   ;;  %vm712_vm4 = vcmask 195712  }
  0x39   : > { %495 = vmatpush.bf16.msra.mxu1 %v446_v7  ;;  %v445_v12 = vpack.c.bf16 %v442_v9, %v441_v8  ;;  %v1082_v14 = vld [vmem:[%s1629_s2] ss:$0 sm:$0xff]  ;;  %v452_v40 = vpack.c.bf16 %v450_v39, %v449_v38  ;;  %v447_v41 = vld [vmem:[#allocation9] sm:$0xff]  ;;  %vm777_vm5 = vcmask 261312   ;;  %s968_s1 = sshll.u32 %s1334_s12, 3  ;;  %s803_s12 = scalar_lea.sflag [#allocation5], %s1518_s24 }
  0x3a   : > { %v1083_v15 = vld [vmem:[%s1631_s4] ss:$0 sm:$0xff]  ;;  %s814_s16 = scalar_lea.hbm %s1636_s9, %s968_s1 }
  0x3b   : > { %512 = vmatpush.bf16.msra.mxu2 %v452_v40  ;;  %v448_v42 = vld [vmem:[#allocation9 + $0x8] sm:$0xff]  ;;  %s818_s25 = sshll.u32 %s814_s16, 4  ;;  %s819_s25 = int_to_ptr.hbm [resolvable:$true] %s818_s25 }
  0x3c   : > { %475 = vmatpush.bf16.msra.mxu0 %v439_v10  ;;  %v451_v43 = vpack.c.bf16 %v448_v42, %v447_v41  ;;  %v1084_v58 = vld [vmem:[%s1633_s6] ss:$0 sm:$0xff] }
  0x3d   : > { %496 = vmatpush.bf16.msra.mxu1 %v445_v12 }
  0x3f   : > { %955 = vmatmul.msk.bf16.vlgmr.msra.gmra.mxu0 %vm464_vm0, %v459_v13  ;;  %513 = vmatpush.bf16.msra.mxu2 %v451_v43 }
  0x40   : > { %956 = vmatmul.msk.bf16.vlgmr.msra.gmra.mxu1 %vm464_vm0, %v459_v13 }
  0x42   : > { %957 = vmatmul.msk.bf16.vlgmr.msra.gmra.mxu2 %vm464_vm0, %v459_v13 }
  0xbc   : > { %v477_v16 = vpop.f32.mrf.mxu0 }
  0xbd   : > { %v478_v17 = vadd.f32 %v1082_v14, %v477_v16  ;;  %v498_v18 = vpop.f32.mrf.mxu1 }
  0xbe   : > { %v499_v19 = vadd.f32 %v1083_v15, %v498_v18 }
  0xbf   : > { %v520_v20 = vmul.f32 0.35355338, %v478_v17 }
  0xc0   : > { %v522_v21 = vpack.c.bf16 %v499_v19, %v499_v19 }
  0xc1   : > { %v521_v22 = vpack.c.bf16 %v520_v20, %v520_v20 }
  0xc2   : > { %651 = vrot.lane.b32.xlu1 %v522_v21, %s1350_s20  ;;  %583 = vrot.lane.b32.xlu0 %v522_v21, %s1351_s23  ;;  %v528_v23 = vsel %vm523_vm1, %v522_v21, 0 }
  0xc3   : > { %537 = vmatpush.bf16.xpose.msra.mxu3 %v528_v23  ;;  %649 = vrot.lane.b32.xlu2 %v521_v22, %s1350_s20 }
  0xc4   : > { %v479_v24 = vpop.f32.mrf.mxu0 }
  0xc5   : > { %v500_v25 = vpop.f32.mrf.mxu1  ;;  %v515_v59 = vpop.f32.mrf.mxu2 }
  0xc6   : > { %v516_v60 = vadd.f32 %v1084_v58, %v515_v59 }
  0xc8   : > { %v519_v63 = vpack.c.bf16 %v516_v60, %v516_v60  ;;  %v455_v60 = vld [vmem:[#allocation11 + $0x10] sm:$0xff] }
  0xca   : > { %716 = vrot.lane.b32.xlu1 %v522_v21, %s1352_s22  ;;  %580 = vrot.lane.b32.xlu0 %v521_v22, %s1351_s23  ;;  %v563_v1 = vsel %vm561_vm2, %v519_v63, 0  ;;  %v620_v2 = vunpack.c.l.b16 %v519_v63 }
  0xcb   : > { %958 = vmatmul.msk.bf16.vlgmr.msra.gmra.mxu3 %vm523_vm1, %v521_v22  ;;  %714 = vrot.lane.b32.xlu2 %v521_v22, %s1352_s22 }
  0xcc   : > { %572 = vmatpush.bf16.msrb.mxu0 %v563_v1  ;;  %v621_v4 = vpack.c.b16 %v620_v2, %v620_v2 }
  0xcd   : > { %v517_v3 = vpop.f32.mrf.mxu2 }
 0x11d   : > { %v650_v30 = vpop.permute.xlu2 %649 }
 0x125   : > { %v715_v34 = vpop.permute.xlu2 %714 }
 0x134   : > { %v652_v26 = vpop.permute.xlu1 %651  ;;  %v584_v27 = vpop.permute.xlu0 %583 }
 0x135   : > { %v589_v28 = vsel %vm523_vm1, %v584_v27, 0  ;;  %v657_v29 = vsel %vm523_vm1, %v652_v26, 0 }
 0x136   : > { %598 = vmatpush.bf16.xpose.msrb.mxu1 %v589_v28  ;;  %666 = vmatpush.bf16.xpose.msrb.mxu3 %v657_v29 }
 0x13c   : > { %v717_v31 = vpop.permute.xlu1 %716  ;;  %v581_v32 = vpop.permute.xlu0 %580 }
 0x13d   : > { %v722_v33 = vsel %vm523_vm1, %v717_v31, 0  ;;  %960 = vmatmul.msk.bf16.vlgmr.msrb.gmra.mxu1 %vm523_vm1, %v581_v32  ;;  %962 = vmatmul.msk.bf16.vlgmr.msrb.gmra.mxu3 %vm523_vm1, %v650_v30 }
 0x13e   : > { %731 = vmatpush.bf16.xpose.msra.mxu1 %v722_v33 }
 0x14d   : > { %964 = vmatmul.msk.bf16.vlgmr.msra.gmra.mxu1 %vm523_vm1, %v715_v34 }
 0x14e   : > { %v539_v35 = vpop.f32.mrf.mxu3 }
 0x14f   : > { %v543_v36 = vsel %vm523_vm1, %v539_v35, -inf }
 0x150   : > { %544 = vmax.xlane.f32.xlu1 %v543_v36 }
 0x156   : > { %v541_v37 = vpop.f32.mrf.mxu3 }
 0x1ba   : > { %v600_v44 = vpop.f32.mrf.mxu1 }
 0x1bb   : > { %v604_v45 = vsel %vm523_vm1, %v600_v44, -inf }
 0x1bc   : > { %605 = vmax.xlane.f32.xlu0 %v604_v45 }
 0x1c0   : > { %v668_v46 = vpop.f32.mrf.mxu3 }
 0x1c1   : > { %v672_v57 = vsel %vm523_vm1, %v668_v46, -inf }
 0x1c2   : > { %v602_v47 = vpop.f32.mrf.mxu1 }
 0x1c3   : > { %v545_v48 = vpop.xlane.xlu1 %544 }
 0x1c4   : > { %v546_v49 = vsub.f32 %v539_v35, %v545_v48 }
 0x1c6   : > { %v547_v50 = vmul.f32 1.442695, %v546_v49 }
 0x1c8   : > { %1086 = vpow2.f32 %v547_v50  ;;  %v670_v51 = vpop.f32.mrf.mxu3 }
 0x1ca   : > { %v733_v52 = vpop.f32.mrf.mxu1 }
 0x1cb   : > { %v737_v53 = vsel %vm523_vm1, %v733_v52, -inf }
 0x1cc   : > { %738 = vmax.xlane.f32.xlu2 %v737_v53 }
 0x1ce   : > { %v1087_v54 = vpop.eup %1086 }
 0x1cf   : > { %v549_v55 = vsel %vm523_vm1, %v1087_v54, 0.0 }
 0x1d0   : > { %550 = vadd.xlane.f32.xlu1 %v549_v55 }
 0x1d2   : > { %v735_v56 = vpop.f32.mrf.mxu1 }
 0x1d4   : > { %673 = vmax.xlane.f32.xlu2 %v672_v57 }
 0x1ec   : > { %622 = vrot.lane.b32.xlu2 %v621_v4, %s1351_s23 }
 0x22f   : > { %v606_v61 = vpop.xlane.xlu0 %605 }
 0x230   : > { %v607_v62 = vsub.f32 %v600_v44, %v606_v61  ;;  %v456_v61 = vld [vmem:[#allocation11 + $0x18] sm:$0xff] }
 0x231   : > { %v458_v63 = vpack.c.bf16 %v456_v61, %v455_v60 }
 0x232   : > { %v608_v0 = vmul.f32 1.442695, %v607_v62  ;;  %v453_v62 = vld [vmem:[#allocation11] sm:$0xff] }
 0x233   : > { %794 = vmatpush.bf16.msra.mxu3 %v458_v63 }
 0x234   : > { %1088 = vpow2.f32 %v608_v0  ;;  %v454_v0 = vld [vmem:[#allocation11 + $0x8] sm:$0xff] }
 0x235   : > { %v457_v1 = vpack.c.bf16 %v454_v0, %v453_v62 }
 0x237   : > { %795 = vmatpush.bf16.msra.mxu3 %v457_v1 }
 0x23a   : > { %v1089_v5 = vpop.eup %1088 }
 0x23b   : > { %v610_v6 = vsel %vm523_vm1, %v1089_v5, 0.0 }
 0x23c   : > { %611 = vadd.xlane.f32.xlu0 %v610_v6  ;;  %v1085_v6 = vld [vmem:[%s1635_s8] ss:$0 sm:$0xff] }
 0x23f   : > { %v739_v7 = vpop.xlane.xlu2 %738 }
 0x240   : > { %v740_v8 = vsub.f32 %v733_v52, %v739_v7 }
 0x242   : > { %v741_v9 = vmul.f32 1.442695, %v740_v8 }
 0x243   : > { %v551_v10 = vpop.xlane.xlu1 %550 }
 0x244   : > { %1090 = vpow2.f32 %v741_v9 }
 0x245   : > { %1092 = vrcp.f32 %v551_v10 }
 0x247   : > { %v674_v11 = vpop.xlane.xlu2 %673 }
 0x248   : > { %v675_v12 = vsub.f32 %v668_v46, %v674_v11 }
 0x24a   : > { %v1091_v13 = vpop.eup %1090  ;;  %v676_v14 = vmul.f32 1.442695, %v675_v12 }
 0x24b   : > { %v1093_v15 = vpop.eup %1092  ;;  %v743_v16 = vsel %vm523_vm1, %v1091_v13, 0.0 }
 0x24c   : > { %v553_v17 = vmul.f32 %v1093_v15, %v551_v10  ;;  %1094 = vpow2.f32 %v676_v14  ;;  %744 = vadd.xlane.f32.xlu0 %v743_v16 }
 0x24e   : > { %v554_v18 = vsub.f32 2.0, %v553_v17 }
 0x24f   : > { %v623_v24 = vpop.permute.xlu2 %622 }
 0x250   : > { %v555_v19 = vmul.f32 %v1093_v15, %v554_v18  ;;  %v628_v25 = vsel %vm561_vm2, %v623_v24, 0 }
 0x251   : > { %637 = vmatpush.bf16.msrb.mxu2 %v628_v25 }
 0x252   : > { %v1095_v20 = vpop.eup %1094  ;;  %v556_v21 = vmul.f32 %v1087_v54, %v555_v19 }
 0x253   : > { %v678_v22 = vsel %vm523_vm1, %v1095_v20, 0.0 }
 0x254   : > { %v557_v23 = vpack.c.bf16 %v556_v21, %v556_v21  ;;  %679 = vadd.xlane.f32.xlu1 %v678_v22 }
 0x256   : > { %959 = vmatmul.msk.bf16.vlgmr.msrb.gmra.mxu0 %vm523_vm1, %v557_v23 }
 0x260   : > { %752 = vrot.lane.b32.xlu0 %v621_v4, %s1352_s22  ;;  %s429_s22 = scalar_lea.vmem [#allocation12], %s949_s21  ;;  %s1272_s21 = scalar_lea.hbm %s1636_s9, 16 }
 0x261   : > { %s816_s15 = sshll.u32 %s429_s22, 4  ;;  %s817_s15 = int_to_ptr.vmem [resolvable:$true] %s816_s15 }
 0x26d   : > { %687 = vrot.lane.b32.xlu1 %v621_v4, %s1350_s20 }
 0x2af   : > { %v612_v26 = vpop.xlane.xlu0 %611 }
 0x2b0   : > { %1096 = vrcp.f32 %v612_v26 }
 0x2b6   : > { %v1097_v27 = vpop.eup %1096 }
 0x2b7   : > { %v614_v28 = vmul.f32 %v1097_v27, %v612_v26 }
 0x2b9   : > { %v615_v29 = vsub.f32 2.0, %v614_v28 }
 0x2bb   : > { %v616_v30 = vmul.f32 %v1097_v27, %v615_v29 }
 0x2bd   : > { %v617_v31 = vmul.f32 %v1089_v5, %v616_v30 }
 0x2bf   : > { %v618_v32 = vpack.c.bf16 %v617_v31, %v617_v31  ;;  %v745_v33 = vpop.xlane.xlu0 %744 }
 0x2c0   : > { %1098 = vrcp.f32 %v745_v33 }
 0x2c1   : > { %961 = vmatmul.msk.bf16.vlgmr.msrb.gmra.mxu2 %vm523_vm1, %v618_v32 }
 0x2c6   : > { %v1099_v34 = vpop.eup %1098 }
 0x2c7   : > { %v747_v35 = vmul.f32 %v1099_v34, %v745_v33  ;;  %v680_v36 = vpop.xlane.xlu1 %679 }
 0x2c8   : > { %1100 = vrcp.f32 %v680_v36 }
 0x2c9   : > { %v748_v37 = vsub.f32 2.0, %v747_v35 }
 0x2cb   : > { %v749_v38 = vmul.f32 %v1099_v34, %v748_v37 }
 0x2cd   : > { %v750_v40 = vmul.f32 %v1091_v13, %v749_v38 }
 0x2ce   : > { %v1101_v39 = vpop.eup %1100 }
 0x2cf   : > { %v682_v41 = vmul.f32 %v1101_v39, %v680_v36  ;;  %v751_v45 = vpack.c.bf16 %v750_v40, %v750_v40 }
 0x2d1   : > { %v683_v46 = vsub.f32 2.0, %v682_v41 }
 0x2d2   : > { %v753_v42 = vpop.permute.xlu0 %752 }
 0x2d3   : > { %v574_v43 = vpop.f32.mrf.mxu0  ;;  %v758_v44 = vsel %vm561_vm2, %v753_v42, 0  ;;  %v684_v47 = vmul.f32 %v1101_v39, %v683_v46 }
 0x2d4   : > { %578 = vst.msk [vmem:[#allocation2] sm:$0xff] %vm523_vm1, %v574_v43  ;;  %767 = vmatpush.bf16.msra.mxu2 %v758_v44 }
 0x2d5   : > { %v685_v49 = vmul.f32 %v1095_v20, %v684_v47 }
 0x2d7   : > { %965 = vmatmul.msk.bf16.vlgmr.msra.gmra.mxu2 %vm523_vm1, %v751_v45  ;;  %v686_v52 = vpack.c.bf16 %v685_v49, %v685_v49 }
 0x2db   : > { %v576_v48 = vpop.f32.mrf.mxu0 }
 0x2df   : > { %v688_v50 = vpop.permute.xlu1 %687 }
 0x2e0   : > { %v693_v51 = vsel %vm561_vm2, %v688_v50, 0 }
 0x2e1   : > { %702 = vmatpush.bf16.msra.mxu0 %v693_v51 }
 0x2e4   : > { %963 = vmatmul.msk.bf16.vlgmr.msra.gmra.mxu0 %vm523_vm1, %v686_v52 }
 0x344   : > { %v639_v53 = vpop.f32.mrf.mxu2 }
 0x345   : > { %644 = vrot.lane.b32.xlu2 %v639_v53, %s1353_s17  ;;  %s1266_s17 = sshra.s32 %s819_s25, 4  ;;  %s1267_s17 = int_to_ptr.hbm [resolvable:$true] %s1266_s17 }
 0x346   : > { %p1273_p9 = scmp.lt.s32.totalorder %s1267_s17, %s1636_s9 }
 0x34c   : > { %v641_v54 = vpop.f32.mrf.mxu2 }
 0x35a   : > { %v769_v55 = vpop.f32.mrf.mxu2 }
 0x35b   : > { %774 = vrot.lane.b32.xlu2 %v769_v55, %s1354_s29  ;;  %s1268_s29 = scalar_lea.hbm %s1267_s17, 8 }
 0x35c   : > { %p1269_p1 = scmp.ne.s32.totalorder %s1267_s17, %s1268_s29  ;;  %p1274_p10 = scmp.lt.s32.totalorder %s1272_s21, %s1268_s29 }
 0x35e   : > { %p1270_p3 = pnand %p1269_p1, %p1498_p0  ;;  %p1275_p12 = por %p1274_p10, %p1273_p9 }
 0x360   : > { %p1271_p8 = pneg %p1270_p3 }
 0x361   : > { %v704_v56 = vpop.f32.mrf.mxu0 }
 0x362   : > { %709 = vrot.lane.b32.xlu0 %v704_v56, %s1355_s18  ;;  %v771_v57 = vpop.f32.mrf.mxu2  ;;  %p1276_p13 = pnand %p1275_p12, %p1271_p8 }
 0x369   : > { %v706_v58 = vpop.f32.mrf.mxu0 }
 0x39f   : > { %v645_v59 = vpop.permute.xlu2 %644 }
 0x3a0   : > { %648 = vst.msk [vmem:[#allocation2] sm:$0xff] %vm647_vm3, %v645_v59 }
 0x3b5   : > { %v775_v3 = vpop.permute.xlu2 %774 }
 0x3d4   : > { %v710_v2 = vpop.permute.xlu0 %709 }
 0x3d5   : > { %713 = vst.msk [vmem:[#allocation2] sm:$0xff] %vm712_vm4, %v710_v2 }
 0x3d6   : > { %778 = vst.msk [vmem:[#allocation2] sm:$0xff] %vm777_vm5, %v775_v3 }
 0x3dd   : > { %v779_v4 = vld [vmem:[#allocation2] sm:$0xff] }
 0x3de   : > { %v780_v5 = vpack.c.bf16 %v779_v4, %v779_v4 }
 0x3e0   : > { %966 = vmatmul.msk.bf16.vlgmr.msra.gmra.mxu3 %vm464_vm0, %v780_v5 }
 0x463   : > { %v797_v7 = vpop.f32.mrf.mxu3 }
 0x464   : > { %v798_v8 = vadd.f32 %v1085_v6, %v797_v7 }
 0x466   : > { %801 = vst.msk [vmem:[%s429_s22] sm:$0xff] %vm464_vm0, %v798_v8 }
 0x467   : > { %1279 = shalt.err (!%p1276_p13)
}
 0x468   : > { %989 = dma.vmem_to_hbm [thread:$0]  (%p1498_p0), %s817_s15, 128, %s819_s25, %s803_s12  }
 0x46b   : > { %v799_v9 = vpop.f32.mrf.mxu3 }
 0x46c PF: > { %s830_s24 = sand.u32 1, %s1322_s30   ;;  %p1009_p2 = pnand %p945_p6, %p1505_p5 }
 0x46d   : > { %s831_s16 = scalar_lea.sflag [#allocation5], %s830_s24 }
 0x46e   : > { %p1010_p4 = pneg %p1009_p2 }
 0x470   : > { %1317 = dma.done.wait (%p1010_p4), %s831_s16, 128  }
 0x471   : > { %1319 = vsyncadd (%p1010_p4), %s831_s16, 4294967168  ;;  %s27_s14 = sadd.s32 1, %s1342_s14   ;;  %s1651_s30 = smov %s1326_s10 }
 0x472   : > { %p24_p7 = scmp.ge.s32.totalorder %s27_s14, 4   ;;  %s1652_s10 = smov %s1330_s11 }
 0x473   : > { %s1653_s11 = smov %s1503_s28  ;;  %s1654_s12 = smov %s1338_s13 }
 0x474   : > { %s1655_s13 = smov %s1657_s26  ;;  %26 = sbr.rel (!%p24_p7) target bundleno = 12 (0xc), region = 118 }
 0x479   :  { %837 = vsyncpa [#allocation4], 1 }
 0x47a   :  { %839 = vsyncpa [#allocation4 + $0x1], 1 }
 0x47b   :  { %840 = vsyncpa [#allocation7], 1 }
 0x47c   :  { %841 = vsyncpa [#allocation10], 1 }
 0x47d   :  { %842 = vsyncpa [#allocation5], 1 }
 0x47e   :  { %844 = vsyncpa [#allocation5 + $0x1], 1 }

// kernel: tpu_custom_call.1
= control target key start
LH: loop header
LB: loop body
LE: loop exit
PB: predicated region body
PF: predicated region fallthrough
CT: control target
= control target key end

     0   :  { %s1627_s0 = inlined_call_operand.hbm [shape: f32[2,8,32], index: 0, kind: input, shape index: {}]   ;;  %s1628_s1 = inlined_call_operand.hbm [shape: f32[32,32], index: 1, kind: input, shape index: {}]   ;;  %s1629_s2 = inlined_call_operand.vmem [shape: f32[1,32], index: 2, kind: input, shape index: {}]   ;;  %s1630_s3 = inlined_call_operand.hbm [shape: f32[32,32], index: 3, kind: input, shape index: {}]   ;;  %s1631_s4 = inlined_call_operand.vmem [shape: f32[1,32], index: 4, kind: input, shape index: {}]   ;;  %s1632_s5 = inlined_call_operand.hbm [shape: f32[32,32], index: 5, kind: input, shape index: {}]   ;;  %s1633_s6 = inlined_call_operand.vmem [shape: f32[1,32], index: 6, kind: input, shape index: {}]   ;;  %s1634_s7 = inlined_call_operand.hbm [shape: f32[32,32], index: 7, kind: input, shape index: {}]   ;;  %s1635_s8 = inlined_call_operand.vmem [shape: f32[1,32], index: 8, kind: input, shape index: {}]   ;;  %s1636_s9 = inlined_call_operand.hbm [shape: f32[2,8,32], index: 9, kind: output, shape index: {}]  }
   0x1   :  { %1638 = sst [smem:[#allocation17_spill]] %s1628_s1 }
   0x2   :  { %1639 = sst [smem:[#allocation18_spill]] %s1630_s3 }
   0x3   :  { %1640 = sst [smem:[#allocation19_spill]] %s1632_s5 }
   0x4   :  { %14 = vsyncpa [#allocation4], 0 }
   0x5   :  { %16 = vsyncpa [#allocation4 + $0x1], 0 }
   0x6   :  { %17 = vsyncpa [#allocation7], 0 }
   0x7   :  { %18 = vsyncpa [#allocation10], 0 }
   0x8   :  { %19 = vsyncpa [#allocation5], 0 }
   0x9   :  { %21 = vsyncpa [#allocation5 + $0x1], 0  ;;  %s1406_s30 = smov 0   ;;  %s1408_s10 = smov 0  }
   0xa   :  { %s1410_s11 = smov 0   ;;  %s1412_s12 = smov 0  }
   0xb   :  { %s1414_s13 = smov 0   ;;  %s1416_s14 = smov 0  }
   0xc LB: > { %s1637_s15 = sadd.s32 4294967295, %s1342_s14   ;;  %p940_p0 = scmp.ge.s32.totalorder %s1342_s14, 1  ;;  %s1342_s14 = sphi %s1416_s14, %s27_s14   ;;  %s1338_s13 = sphi %s1414_s13, %s1655_s13   ;;  %s1334_s12 = sphi %s1412_s12, %s1654_s12   ;;  %s1330_s11 = sphi %s1410_s11, %s1653_s11   ;;  %s1326_s10 = sphi %s1408_s10, %s1652_s10   ;;  %s1322_s30 = sphi %s1406_s30, %s1651_s30  }
   0xd   : > { %p1440_p1 = scmp.eq.s32.totalorder %s1637_s15, 0  ;;  %p266_p2 = scmp.lt.s32.totalorder %s1342_s14, 3 }
   0xe   : > { %s1642_s1 = sld [smem:[#allocation17_spill]]  ;;  %s1344_s21 = smov [#allocation6]  }
   0xf   : > { %p1448_p3 = pnand %p940_p0, %p266_p2  ;;  %s279_s22 = sshll.u32 %s1344_s21, 4  ;;  %s280_s22 = int_to_ptr.vmem [resolvable:$true] %s279_s22 }
  0x10   : > { %p945_p6 = scmp.ge.s32.totalorder %s1342_s14, 2  ;;  %s1645_s5 = sld [smem:[#allocation19_spill]] }
  0x11   : > { %p991_p4 = pneg %p1448_p3  ;;  %s1345_s27 = smov 128  }
  0x12   : > { %s1346_s28 = smov 8   ;;  %s1347_s29 = smov [#allocation9]  }
  0x13   : > { %p1456_p5 = pnand %p991_p4, %p1440_p1  ;;  %s313_s17 = sshll.u32 %s1347_s29, 4  ;;  %s314_s17 = int_to_ptr.vmem [resolvable:$true] %s313_s17 }
  0x14   : > { %s277_s19 = sshll.u32 %s1642_s1, 4  ;;  %s1646_s3 = sld [smem:[#allocation18_spill]]  ;;  %s278_s19 = int_to_ptr.hbm [resolvable:$true] %s277_s19 }
  0x15   : > { %994 = dma.hbm_to_vmem [thread:$0]  (!%p1456_p5), %s278_s19, 512, %s280_s22, [#allocation7], %s1345_s27, %s1345_s27, %s1346_s28  }
  0x16   : > { %s311_s26 = sshll.u32 %s1645_s5, 4  ;;  %s328_s19 = sshll.u32 %s1634_s7, 4  ;;  %s312_s26 = int_to_ptr.hbm [resolvable:$true] %s311_s26  ;;  %s329_s19 = int_to_ptr.hbm [resolvable:$true] %s328_s19 }
  0x17   : > { %1000 = dma.hbm_to_vmem [thread:$0]  (!%p1456_p5), %s312_s26, 512, %s314_s17, [#allocation10], %s1345_s27, %s1345_s27, %s1346_s28  }
  0x18   : > { %s1348_s22 = smov [#allocation8]   ;;  %s1349_s18 = smov [#allocation11]  }
  0x19   : > { %s296_s29 = sshll.u32 %s1348_s22, 4  ;;  %s330_s21 = sshll.u32 %s1349_s18, 4  ;;  %s297_s29 = int_to_ptr.vmem [resolvable:$true] %s296_s29  ;;  %s331_s21 = int_to_ptr.vmem [resolvable:$true] %s330_s21 }
  0x1a   : > { %s294_s15 = sshll.u32 %s1646_s3, 4  ;;  %s39_s26 = sadd.s32 1, %s1338_s13  ;;  %s295_s15 = int_to_ptr.hbm [resolvable:$true] %s294_s15 }
  0x1b   : > { %997 = dma.hbm_to_vmem [thread:$0]  (!%p1456_p5), %s295_s15, 512, %s297_s29, [#allocation7], %s1345_s27, %s1345_s27, %s1346_s28  }
  0x1c   : > { %1003 = dma.hbm_to_vmem [thread:$0]  (!%p1456_p5), %s329_s19, 512, %s331_s21, [#allocation10], %s1345_s27, %s1345_s27, %s1346_s28  }
  0x1d   : > { %s939_s17 = sadd.s32 4294967294, %s1342_s14   ;;  %p41_p7 = scmp.ge.s32.totalorder %s39_s26, 2 }
  0x1e   : > { %s46_s24 = sadd.s32 1, %s1330_s11  ;;  %p53_p8 = scmp.ne.s32.totalorder %s1330_s11, %s1326_s10 }
  0x1f   : > { %s1657_s26 = smov (%p41_p7, %s39_s26), 0  ;;  %p54_p9 = scmp.eq.s32.totalorder %s1342_s14, 0 }
  0x20   : > { %p59_p10 = scmp.ne.s32.totalorder %s1326_s10, %s1322_s30  ;;  %s43_s15 = ssub.s32 %s1338_s13, %s1657_s26 }
  0x21   : > { %s1647_s25 = sadd.s32 4294967295, %s1342_s14   ;;  %p44_p12 = scmp.eq.s32.totalorder %s43_s15, 0 }
  0x22   : > { %p253_p11 = scmp.eq.s32.totalorder %s1647_s25, 1  ;;  %p1494_p13 = por %p1440_p1, %p59_p10 }
  0x23   : > { %p259_p2 = scmp.eq.s32.totalorder %s939_s17, 1  ;;  %p55_p4 = por %p54_p9, %p53_p8 }
  0x24   : > { %p1498_p0 = por %p253_p11, %p53_p8  ;;  %s347_s22 = sand.u32 1, %s1330_s11  }
  0x25   : > { %s1503_s28 = scalar_select %p44_p12, %s1330_s11, %s46_s24  }
  0x26   : > { %p1505_p5 = por %p259_p2, %p59_p10  ;;  %s947_s29 = sshll.u32 %s1338_s13, 3 }
  0x27   : > { %p1016_p7 = scmp.lt.s32.totalorder %s1342_s14, 2  ;;  %s946_s18 = sshll.u32 %s347_s22, 3 }
  0x28   : > { %s355_s25 = scalar_lea.hbm %s1627_s0, %s947_s29  ;;  %s351_s3 = scalar_lea.vmem [#allocation3], %s946_s18 }
  0x29   : > { %s357_s1 = sshll.u32 %s355_s25, 4  ;;  %s359_s5 = sshll.u32 %s351_s3, 4  ;;  %s358_s1 = int_to_ptr.hbm [resolvable:$true] %s357_s1  ;;  %s360_s5 = int_to_ptr.vmem [resolvable:$true] %s359_s5 }
  0x2a   : > { %p1005_p11 = pnand %p1016_p7, %p55_p4  ;;  %s348_s17 = scalar_lea.sflag [#allocation4], %s347_s22 }
  0x2b   : > { %368 = sbr.rel (%p1448_p3) target bundleno = 1132 (0x46c), region = 56  ;;  %s1518_s24 = sand.u32 (!%p1448_p3), 1, %s1326_s10  }
  0x2c   : > { %1007 = dma.hbm_to_vmem [thread:$0]  (!%p1005_p11), %s358_s1, 128, %s360_s5, %s348_s17  }
  0x2d   : > { %s949_s21 = sshll.u32 (!%p1448_p3), %s1518_s24, 3  ;;  %s371_s29 = scalar_lea.sflag (!%p1448_p3), [#allocation4], %s1518_s24 }
  0x2e   : > { %s374_s18 = scalar_lea.vmem (!%p1448_p3), [#allocation3], %s949_s21 }
  0x30   : > { %1305 = dma.done.wait (%p1494_p13), %s371_s29, 128  }
  0x31   : > { %1307 = vsyncadd (%p1494_p13), %s371_s29, 4294967168 }
  0x32   : > { %1309 = dma.done.wait (%p1440_p1), [#allocation7], 1024  }
  0x33   : > { %1311 = vsyncadd (%p1440_p1), [#allocation7], 4294966272 }
  0x34   : > { %1313 = dma.done.wait (%p1440_p1), [#allocation10], 1024  }
  0x35   : > { %1315 = vsyncadd (%p1440_p1), [#allocation10], 4294966272  ;;  %v437_v0 = vld [vmem:[#allocation6 + $0x10] sm:$0xff]  ;;  %v438_v1 = vld [vmem:[#allocation6 + $0x18] sm:$0xff]  ;;  %vm464_vm0 = vcmask 261120   ;;  %vm523_vm1 = vcmask 64512  }
  0x36   : > { %v443_v2 = vld [vmem:[#allocation8 + $0x10] sm:$0xff]  ;;  %v440_v3 = vpack.c.bf16 %v438_v1, %v437_v0  ;;  %v444_v4 = vld [vmem:[#allocation8 + $0x18] sm:$0xff]  ;;  %v435_v5 = vld [vmem:[#allocation6] sm:$0xff]  ;;  %s1350_s20 = smov 112   ;;  %s1351_s23 = smov 120   ;;  %vm561_vm2 = vcmask 1043456  }
  0x37   : > { %v436_v6 = vld [vmem:[#allocation6 + $0x8] sm:$0xff]  ;;  %v446_v7 = vpack.c.bf16 %v444_v4, %v443_v2  ;;  %v441_v8 = vld [vmem:[#allocation8] sm:$0xff]  ;;  %v433_v11 = vld [vmem:[%s374_s18] sm:$0xff]  ;;  %s1352_s22 = smov 104   ;;  %s1353_s17 = smov 8   ;;  %vm647_vm3 = vcmask 130112  }
  0x38   : > { %v442_v9 = vld [vmem:[#allocation8 + $0x8] sm:$0xff]  ;;  %474 = vmatpush.bf16.msra.mxu0 %v440_v3  ;;  %v439_v10 = vpack.c.bf16 %v436_v6, %v435_v5  ;;  %v459_v13 = vpack.c.bf16 %v433_v11, %v433_v11  ;;  %v449_v38 = vld [vmem:[#allocation9 + $0x10] sm:$0xff]  ;;  %v450_v39 = vld [vmem:[#allocation9 + $0x18] sm:$0xff]  ;;  %s1354_s29 = smov 24   ;;  %s1355_s18 = smov 16   ;;  %vm712_vm4 = vcmask 195712  }
  0x39   : > { %495 = vmatpush.bf16.msra.mxu1 %v446_v7  ;;  %v445_v12 = vpack.c.bf16 %v442_v9, %v441_v8  ;;  %v1082_v14 = vld [vmem:[%s1629_s2] ss:$0 sm:$0xff]  ;;  %v452_v40 = vpack.c.bf16 %v450_v39, %v449_v38  ;;  %v447_v41 = vld [vmem:[#allocation9] sm:$0xff]  ;;  %vm777_vm5 = vcmask 261312   ;;  %s968_s1 = sshll.u32 %s1334_s12, 3  ;;  %s803_s12 = scalar_lea.sflag [#allocation5], %s1518_s24 }
  0x3a   : > { %v1083_v15 = vld [vmem:[%s1631_s4] ss:$0 sm:$0xff]  ;;  %s814_s16 = scalar_lea.hbm %s1636_s9, %s968_s1 }
  0x3b   : > { %512 = vmatpush.bf16.msra.mxu2 %v452_v40  ;;  %v448_v42 = vld [vmem:[#allocation9 + $0x8] sm:$0xff]  ;;  %s818_s25 = sshll.u32 %s814_s16, 4  ;;  %s819_s25 = int_to_ptr.hbm [resolvable:$true] %s818_s25 }
  0x3c   : > { %475 = vmatpush.bf16.msra.mxu0 %v439_v10  ;;  %v451_v43 = vpack.c.bf16 %v448_v42, %v447_v41  ;;  %v1084_v58 = vld [vmem:[%s1633_s6] ss:$0 sm:$0xff] }
  0x3d   : > { %496 = vmatpush.bf16.msra.mxu1 %v445_v12 }
  0x3f   : > { %955 = vmatmul.msk.bf16.vlgmr.msra.gmra.mxu0 %vm464_vm0, %v459_v13  ;;  %513 = vmatpush.bf16.msra.mxu2 %v451_v43 }
  0x40   : > { %956 = vmatmul.msk.bf16.vlgmr.msra.gmra.mxu1 %vm464_vm0, %v459_v13 }
  0x42   : > { %957 = vmatmul.msk.bf16.vlgmr.msra.gmra.mxu2 %vm464_vm0, %v459_v13 }
  0xbc   : > { %v477_v16 = vpop.f32.mrf.mxu0 }
  0xbd   : > { %v478_v17 = vadd.f32 %v1082_v14, %v477_v16  ;;  %v498_v18 = vpop.f32.mrf.mxu1 }
  0xbe   : > { %v499_v19 = vadd.f32 %v1083_v15, %v498_v18 }
  0xbf   : > { %v520_v20 = vmul.f32 0.35355338, %v478_v17 }
  0xc0   : > { %v522_v21 = vpack.c.bf16 %v499_v19, %v499_v19 }
  0xc1   : > { %v521_v22 = vpack.c.bf16 %v520_v20, %v520_v20 }
  0xc2   : > { %651 = vrot.lane.b32.xlu1 %v522_v21, %s1350_s20  ;;  %583 = vrot.lane.b32.xlu0 %v522_v21, %s1351_s23  ;;  %v528_v23 = vsel %vm523_vm1, %v522_v21, 0 }
  0xc3   : > { %537 = vmatpush.bf16.xpose.msra.mxu3 %v528_v23  ;;  %649 = vrot.lane.b32.xlu2 %v521_v22, %s1350_s20 }
  0xc4   : > { %v479_v24 = vpop.f32.mrf.mxu0 }
  0xc5   : > { %v500_v25 = vpop.f32.mrf.mxu1  ;;  %v515_v59 = vpop.f32.mrf.mxu2 }
  0xc6   : > { %v516_v60 = vadd.f32 %v1084_v58, %v515_v59 }
  0xc8   : > { %v519_v63 = vpack.c.bf16 %v516_v60, %v516_v60  ;;  %v455_v60 = vld [vmem:[#allocation11 + $0x10] sm:$0xff] }
  0xca   : > { %716 = vrot.lane.b32.xlu1 %v522_v21, %s1352_s22  ;;  %580 = vrot.lane.b32.xlu0 %v521_v22, %s1351_s23  ;;  %v563_v1 = vsel %vm561_vm2, %v519_v63, 0  ;;  %v620_v2 = vunpack.c.l.b16 %v519_v63 }
  0xcb   : > { %958 = vmatmul.msk.bf16.vlgmr.msra.gmra.mxu3 %vm523_vm1, %v521_v22  ;;  %714 = vrot.lane.b32.xlu2 %v521_v22, %s1352_s22 }
  0xcc   : > { %572 = vmatpush.bf16.msrb.mxu0 %v563_v1  ;;  %v621_v4 = vpack.c.b16 %v620_v2, %v620_v2 }
  0xcd   : > { %v517_v3 = vpop.f32.mrf.mxu2 }
 0x11d   : > { %v650_v30 = vpop.permute.xlu2 %649 }
 0x125   : > { %v715_v34 = vpop.permute.xlu2 %714 }
 0x134   : > { %v652_v26 = vpop.permute.xlu1 %651  ;;  %v584_v27 = vpop.permute.xlu0 %583 }
 0x135   : > { %v589_v28 = vsel %vm523_vm1, %v584_v27, 0  ;;  %v657_v29 = vsel %vm523_vm1, %v652_v26, 0 }
 0x136   : > { %598 = vmatpush.bf16.xpose.msrb.mxu1 %v589_v28  ;;  %666 = vmatpush.bf16.xpose.msrb.mxu3 %v657_v29 }
 0x13c   : > { %v717_v31 = vpop.permute.xlu1 %716  ;;  %v581_v32 = vpop.permute.xlu0 %580 }
 0x13d   : > { %v722_v33 = vsel %vm523_vm1, %v717_v31, 0  ;;  %960 = vmatmul.msk.bf16.vlgmr.msrb.gmra.mxu1 %vm523_vm1, %v581_v32  ;;  %962 = vmatmul.msk.bf16.vlgmr.msrb.gmra.mxu3 %vm523_vm1, %v650_v30 }
 0x13e   : > { %731 = vmatpush.bf16.xpose.msra.mxu1 %v722_v33 }
 0x14d   : > { %964 = vmatmul.msk.bf16.vlgmr.msra.gmra.mxu1 %vm523_vm1, %v715_v34 }
 0x14e   : > { %v539_v35 = vpop.f32.mrf.mxu3 }
 0x14f   : > { %v543_v36 = vsel %vm523_vm1, %v539_v35, -inf }
 0x150   : > { %544 = vmax.xlane.f32.xlu1 %v543_v36 }
 0x156   : > { %v541_v37 = vpop.f32.mrf.mxu3 }
 0x1ba   : > { %v600_v44 = vpop.f32.mrf.mxu1 }
 0x1bb   : > { %v604_v45 = vsel %vm523_vm1, %v600_v44, -inf }
 0x1bc   : > { %605 = vmax.xlane.f32.xlu0 %v604_v45 }
 0x1c0   : > { %v668_v46 = vpop.f32.mrf.mxu3 }
 0x1c1   : > { %v672_v57 = vsel %vm523_vm1, %v668_v46, -inf }
 0x1c2   : > { %v602_v47 = vpop.f32.mrf.mxu1 }
 0x1c3   : > { %v545_v48 = vpop.xlane.xlu1 %544 }
 0x1c4   : > { %v546_v49 = vsub.f32 %v539_v35, %v545_v48 }
 0x1c6   : > { %v547_v50 = vmul.f32 1.442695, %v546_v49 }
 0x1c8   : > { %1086 = vpow2.f32 %v547_v50  ;;  %v670_v51 = vpop.f32.mrf.mxu3 }
 0x1ca   : > { %v733_v52 = vpop.f32.mrf.mxu1 }
 0x1cb   : > { %v737_v53 = vsel %vm523_vm1, %v733_v52, -inf }
 0x1cc   : > { %738 = vmax.xlane.f32.xlu2 %v737_v53 }
 0x1ce   : > { %v1087_v54 = vpop.eup %1086 }
 0x1cf   : > { %v549_v55 = vsel %vm523_vm1, %v1087_v54, 0.0 }
 0x1d0   : > { %550 = vadd.xlane.f32.xlu1 %v549_v55 }
 0x1d2   : > { %v735_v56 = vpop.f32.mrf.mxu1 }
 0x1d4   : > { %673 = vmax.xlane.f32.xlu2 %v672_v57 }
 0x1ec   : > { %622 = vrot.lane.b32.xlu2 %v621_v4, %s1351_s23 }
 0x22f   : > { %v606_v61 = vpop.xlane.xlu0 %605 }
 0x230   : > { %v607_v62 = vsub.f32 %v600_v44, %v606_v61  ;;  %v456_v61 = vld [vmem:[#allocation11 + $0x18] sm:$0xff] }
 0x231   : > { %v458_v63 = vpack.c.bf16 %v456_v61, %v455_v60 }
 0x232   : > { %v608_v0 = vmul.f32 1.442695, %v607_v62  ;;  %v453_v62 = vld [vmem:[#allocation11] sm:$0xff] }
 0x233   : > { %794 = vmatpush.bf16.msra.mxu3 %v458_v63 }
 0x234   : > { %1088 = vpow2.f32 %v608_v0  ;;  %v454_v0 = vld [vmem:[#allocation11 + $0x8] sm:$0xff] }
 0x235   : > { %v457_v1 = vpack.c.bf16 %v454_v0, %v453_v62 }
 0x237   : > { %795 = vmatpush.bf16.msra.mxu3 %v457_v1 }
 0x23a   : > { %v1089_v5 = vpop.eup %1088 }
 0x23b   : > { %v610_v6 = vsel %vm523_vm1, %v1089_v5, 0.0 }
 0x23c   : > { %611 = vadd.xlane.f32.xlu0 %v610_v6  ;;  %v1085_v6 = vld [vmem:[%s1635_s8] ss:$0 sm:$0xff] }
 0x23f   : > { %v739_v7 = vpop.xlane.xlu2 %738 }
 0x240   : > { %v740_v8 = vsub.f32 %v733_v52, %v739_v7 }
 0x242   : > { %v741_v9 = vmul.f32 1.442695, %v740_v8 }
 0x243   : > { %v551_v10 = vpop.xlane.xlu1 %550 }
 0x244   : > { %1090 = vpow2.f32 %v741_v9 }
 0x245   : > { %1092 = vrcp.f32 %v551_v10 }
 0x247   : > { %v674_v11 = vpop.xlane.xlu2 %673 }
 0x248   : > { %v675_v12 = vsub.f32 %v668_v46, %v674_v11 }
 0x24a   : > { %v1091_v13 = vpop.eup %1090  ;;  %v676_v14 = vmul.f32 1.442695, %v675_v12 }
 0x24b   : > { %v1093_v15 = vpop.eup %1092  ;;  %v743_v16 = vsel %vm523_vm1, %v1091_v13, 0.0 }
 0x24c   : > { %v553_v17 = vmul.f32 %v1093_v15, %v551_v10  ;;  %1094 = vpow2.f32 %v676_v14  ;;  %744 = vadd.xlane.f32.xlu0 %v743_v16 }
 0x24e   : > { %v554_v18 = vsub.f32 2.0, %v553_v17 }
 0x24f   : > { %v623_v24 = vpop.permute.xlu2 %622 }
 0x250   : > { %v555_v19 = vmul.f32 %v1093_v15, %v554_v18  ;;  %v628_v25 = vsel %vm561_vm2, %v623_v24, 0 }
 0x251   : > { %637 = vmatpush.bf16.msrb.mxu2 %v628_v25 }
 0x252   : > { %v1095_v20 = vpop.eup %1094  ;;  %v556_v21 = vmul.f32 %v1087_v54, %v555_v19 }
 0x253   : > { %v678_v22 = vsel %vm523_vm1, %v1095_v20, 0.0 }
 0x254   : > { %v557_v23 = vpack.c.bf16 %v556_v21, %v556_v21  ;;  %679 = vadd.xlane.f32.xlu1 %v678_v22 }
 0x256   : > { %959 = vmatmul.msk.bf16.vlgmr.msrb.gmra.mxu0 %vm523_vm1, %v557_v23 }
 0x260   : > { %752 = vrot.lane.b32.xlu0 %v621_v4, %s1352_s22  ;;  %s429_s22 = scalar_lea.vmem [#allocation12], %s949_s21  ;;  %s1272_s21 = scalar_lea.hbm %s1636_s9, 16 }
 0x261   : > { %s816_s15 = sshll.u32 %s429_s22, 4  ;;  %s817_s15 = int_to_ptr.vmem [resolvable:$true] %s816_s15 }
 0x26d   : > { %687 = vrot.lane.b32.xlu1 %v621_v4, %s1350_s20 }
 0x2af   : > { %v612_v26 = vpop.xlane.xlu0 %611 }
 0x2b0   : > { %1096 = vrcp.f32 %v612_v26 }
 0x2b6   : > { %v1097_v27 = vpop.eup %1096 }
 0x2b7   : > { %v614_v28 = vmul.f32 %v1097_v27, %v612_v26 }
 0x2b9   : > { %v615_v29 = vsub.f32 2.0, %v614_v28 }
 0x2bb   : > { %v616_v30 = vmul.f32 %v1097_v27, %v615_v29 }
 0x2bd   : > { %v617_v31 = vmul.f32 %v1089_v5, %v616_v30 }
 0x2bf   : > { %v618_v32 = vpack.c.bf16 %v617_v31, %v617_v31  ;;  %v745_v33 = vpop.xlane.xlu0 %744 }
 0x2c0   : > { %1098 = vrcp.f32 %v745_v33 }
 0x2c1   : > { %961 = vmatmul.msk.bf16.vlgmr.msrb.gmra.mxu2 %vm523_vm1, %v618_v32 }
 0x2c6   : > { %v1099_v34 = vpop.eup %1098 }
 0x2c7   : > { %v747_v35 = vmul.f32 %v1099_v34, %v745_v33  ;;  %v680_v36 = vpop.xlane.xlu1 %679 }
 0x2c8   : > { %1100 = vrcp.f32 %v680_v36 }
 0x2c9   : > { %v748_v37 = vsub.f32 2.0, %v747_v35 }
 0x2cb   : > { %v749_v38 = vmul.f32 %v1099_v34, %v748_v37 }
 0x2cd   : > { %v750_v40 = vmul.f32 %v1091_v13, %v749_v38 }
 0x2ce   : > { %v1101_v39 = vpop.eup %1100 }
 0x2cf   : > { %v682_v41 = vmul.f32 %v1101_v39, %v680_v36  ;;  %v751_v45 = vpack.c.bf16 %v750_v40, %v750_v40 }
 0x2d1   : > { %v683_v46 = vsub.f32 2.0, %v682_v41 }
 0x2d2   : > { %v753_v42 = vpop.permute.xlu0 %752 }
 0x2d3   : > { %v574_v43 = vpop.f32.mrf.mxu0  ;;  %v758_v44 = vsel %vm561_vm2, %v753_v42, 0  ;;  %v684_v47 = vmul.f32 %v1101_v39, %v683_v46 }
 0x2d4   : > { %578 = vst.msk [vmem:[#allocation2] sm:$0xff] %vm523_vm1, %v574_v43  ;;  %767 = vmatpush.bf16.msra.mxu2 %v758_v44 }
 0x2d5   : > { %v685_v49 = vmul.f32 %v1095_v20, %v684_v47 }
 0x2d7   : > { %965 = vmatmul.msk.bf16.vlgmr.msra.gmra.mxu2 %vm523_vm1, %v751_v45  ;;  %v686_v52 = vpack.c.bf16 %v685_v49, %v685_v49 }
 0x2db   : > { %v576_v48 = vpop.f32.mrf.mxu0 }
 0x2df   : > { %v688_v50 = vpop.permute.xlu1 %687 }
 0x2e0   : > { %v693_v51 = vsel %vm561_vm2, %v688_v50, 0 }
 0x2e1   : > { %702 = vmatpush.bf16.msra.mxu0 %v693_v51 }
 0x2e4   : > { %963 = vmatmul.msk.bf16.vlgmr.msra.gmra.mxu0 %vm523_vm1, %v686_v52 }
 0x344   : > { %v639_v53 = vpop.f32.mrf.mxu2 }
 0x345   : > { %644 = vrot.lane.b32.xlu2 %v639_v53, %s1353_s17  ;;  %s1266_s17 = sshra.s32 %s819_s25, 4  ;;  %s1267_s17 = int_to_ptr.hbm [resolvable:$true] %s1266_s17 }
 0x346   : > { %p1273_p9 = scmp.lt.s32.totalorder %s1267_s17, %s1636_s9 }
 0x34c   : > { %v641_v54 = vpop.f32.mrf.mxu2 }
 0x35a   : > { %v769_v55 = vpop.f32.mrf.mxu2 }
 0x35b   : > { %774 = vrot.lane.b32.xlu2 %v769_v55, %s1354_s29  ;;  %s1268_s29 = scalar_lea.hbm %s1267_s17, 8 }
 0x35c   : > { %p1269_p1 = scmp.ne.s32.totalorder %s1267_s17, %s1268_s29  ;;  %p1274_p10 = scmp.lt.s32.totalorder %s1272_s21, %s1268_s29 }
 0x35e   : > { %p1270_p3 = pnand %p1269_p1, %p1498_p0  ;;  %p1275_p12 = por %p1274_p10, %p1273_p9 }
 0x360   : > { %p1271_p8 = pneg %p1270_p3 }
 0x361   : > { %v704_v56 = vpop.f32.mrf.mxu0 }
 0x362   : > { %709 = vrot.lane.b32.xlu0 %v704_v56, %s1355_s18  ;;  %v771_v57 = vpop.f32.mrf.mxu2  ;;  %p1276_p13 = pnand %p1275_p12, %p1271_p8 }
 0x369   : > { %v706_v58 = vpop.f32.mrf.mxu0 }
 0x39f   : > { %v645_v59 = vpop.permute.xlu2 %644 }
 0x3a0   : > { %648 = vst.msk [vmem:[#allocation2] sm:$0xff] %vm647_vm3, %v645_v59 }
 0x3b5   : > { %v775_v3 = vpop.permute.xlu2 %774 }
 0x3d4   : > { %v710_v2 = vpop.permute.xlu0 %709 }
 0x3d5   : > { %713 = vst.msk [vmem:[#allocation2] sm:$0xff] %vm712_vm4, %v710_v2 }
 0x3d6   : > { %778 = vst.msk [vmem:[#allocation2] sm:$0xff] %vm777_vm5, %v775_v3 }
 0x3dd   : > { %v779_v4 = vld [vmem:[#allocation2] sm:$0xff] }
 0x3de   : > { %v780_v5 = vpack.c.bf16 %v779_v4, %v779_v4 }
 0x3e0   : > { %966 = vmatmul.msk.bf16.vlgmr.msra.gmra.mxu3 %vm464_vm0, %v780_v5 }
 0x463   : > { %v797_v7 = vpop.f32.mrf.mxu3 }
 0x464   : > { %v798_v8 = vadd.f32 %v1085_v6, %v797_v7 }
 0x466   : > { %801 = vst.msk [vmem:[%s429_s22] sm:$0xff] %vm464_vm0, %v798_v8 }
 0x467   : > { %1279 = shalt.err (!%p1276_p13)
}
 0x468   : > { %989 = dma.vmem_to_hbm [thread:$0]  (%p1498_p0), %s817_s15, 128, %s819_s25, %s803_s12  }
 0x46b   : > { %v799_v9 = vpop.f32.mrf.mxu3 }
 0x46c PF: > { %s830_s24 = sand.u32 1, %s1322_s30   ;;  %p1009_p2 = pnand %p945_p6, %p1505_p5 }
 0x46d   : > { %s831_s16 = scalar_lea.sflag [#allocation5], %s830_s24 }
 0x46e   : > { %p1010_p4 = pneg %p1009_p2 }
 0x470   : > { %1317 = dma.done.wait (%p1010_p4), %s831_s16, 128  }
 0x471   : > { %1319 = vsyncadd (%p1010_p4), %s831_s16, 4294967168  ;;  %s27_s14 = sadd.s32 1, %s1342_s14   ;;  %s1651_s30 = smov %s1326_s10 }
 0x472   : > { %p24_p7 = scmp.ge.s32.totalorder %s27_s14, 4   ;;  %s1652_s10 = smov %s1330_s11 }
 0x473   : > { %s1653_s11 = smov %s1503_s28  ;;  %s1654_s12 = smov %s1338_s13 }
 0x474   : > { %s1655_s13 = smov %s1657_s26  ;;  %26 = sbr.rel (!%p24_p7) target bundleno = 12 (0xc), region = 118 }
 0x479   :  { %837 = vsyncpa [#allocation4], 1 }
 0x47a   :  { %839 = vsyncpa [#allocation4 + $0x1], 1 }
 0x47b   :  { %840 = vsyncpa [#allocation7], 1 }
 0x47c   :  { %841 = vsyncpa [#allocation10], 1 }
 0x47d   :  { %842 = vsyncpa [#allocation5], 1 }
 0x47e   :  { %844 = vsyncpa [#allocation5 + $0x1], 1 }

</bundles_post_ra>
